<compile_context>
chip_gen: v7x
topology: tpu7x:2x2x1
jax: 0.10.0
libtpu: 0.0.40
codegen_flags: <defaults>
</compile_context>

<pallas_src>
import functools

import jax
import jax.numpy as jnp
from jax.experimental import pallas as pl
from jax.experimental.pallas import tpu as pltpu


def _round_up(x, m):
    return ((x + m - 1) // m) * m


def _pad_to(x, shape):
    pads = [(0, t - s) for s, t in zip(x.shape, shape)]
    return jnp.pad(x, pads)


def _vmem_limit(footprint_bytes):
    # Footprint-derived scoped-VMEM request: 2x headroom for compiler scratch,
    # clamped to [16 MiB, 60 MiB] so it is valid on v5e/v6e (128 MiB physical)
    # and on v7x (64 MiB physical per TensorCore).
    return int(min(max(2 * footprint_bytes, 16 << 20), 60 << 20))


# --------- Kernel 1: fused GRU cell + dot-attention (S-tiled) + concat-Linear --

def gru_attn_kernel(x_ref, h_ref, enc_ref, wih_ref, whh_ref, bih_ref, bhh_ref,
                    wc_ref, bc_ref, cat_ref, hnew_ref,
                    m_sc, l_sc, acc_sc, *, seq_len, tile_s):
    si = pl.program_id(0)
    Hp = h_ref.shape[1]

    @pl.when(si == 0)
    def _():
        # GRU cell (PyTorch gate order r, z, n), exact reference formulation:
        #   gi = x @ Wih + bih ; gh = h @ Whh + bhh
        #   r = sig(gi_r+gh_r); z = sig(gi_z+gh_z); n = tanh(gi_n + r*gh_n)
        gi = jnp.dot(x_ref[...], wih_ref[...],
                     preferred_element_type=jnp.float32) + bih_ref[...]
        gh = jnp.dot(h_ref[...].astype(jnp.bfloat16), whh_ref[...],
                     preferred_element_type=jnp.float32) + bhh_ref[...]
        r = jax.nn.sigmoid(gi[:, 0 * Hp:1 * Hp] + gh[:, 0 * Hp:1 * Hp])
        z = jax.nn.sigmoid(gi[:, 1 * Hp:2 * Hp] + gh[:, 1 * Hp:2 * Hp])
        n = jnp.tanh(gi[:, 2 * Hp:3 * Hp] + r * gh[:, 2 * Hp:3 * Hp])
        hnew_ref[...] = (1.0 - z) * n + z * h_ref[...]
        # init online-softmax accumulators
        m_sc[...] = jnp.full_like(m_sc, -1e30)
        l_sc[...] = jnp.zeros_like(l_sc)
        acc_sc[...] = jnp.zeros_like(acc_sc)

    # ---- dot attention over this S tile: flash-style online softmax ----
    enc = enc_ref[...]                                       # (Bp, TS, Hp) bf16
    q = hnew_ref[...].astype(jnp.bfloat16)[:, None, :]       # (Bp, 1, Hp)
    scores = jnp.einsum('bqh,bsh->bqs', q, enc,
                        preferred_element_type=jnp.float32)  # (Bp, 1, TS)
    s_pos = si * tile_s + jax.lax.broadcasted_iota(jnp.int32, scores.shape, 2)
    scores = jnp.where(s_pos < seq_len, scores, -1e30)       # mask padded positions
    m_prev = m_sc[...]
    m_new = jnp.maximum(m_prev, jnp.max(scores, axis=2, keepdims=True))
    alpha = jnp.exp(m_prev - m_new)
    p = jnp.exp(scores - m_new)                              # (Bp, 1, TS)
    l_sc[...] = alpha * l_sc[...] + jnp.sum(p, axis=2, keepdims=True)
    acc_sc[...] = alpha * acc_sc[...] + jnp.einsum(
        'bqs,bsh->bqh', p.astype(jnp.bfloat16), enc,
        preferred_element_type=jnp.float32)
    m_sc[...] = m_new

    @pl.when(si == pl.num_programs(0) - 1)
    def _():
        # approx reciprocal (EUP, free slot): attention weights sum to 1 only to
        # ~1e-3 relative accuracy — fine at bf16-weight tolerances.
        ctx = (acc_sc[...] * pl.reciprocal(l_sc[...], approx=True))[:, 0, :]
        # concat Linear + tanh: single MXU matmul on [h_new | context]
        cat_in = jnp.concatenate([hnew_ref[...], ctx], axis=1).astype(jnp.bfloat16)
        cat_ref[...] = jnp.tanh(
            jnp.dot(cat_in, wc_ref[...], preferred_element_type=jnp.float32)
            + bc_ref[...]).astype(jnp.bfloat16)


# --------- Kernel 2: output projection, tiled over the vocab -------------------

def vocab_proj_kernel(cat_ref, wo_ref, bo_ref, logits_ref):
    logits_ref[...] = (
        jnp.dot(cat_ref[...], wo_ref[...], preferred_element_type=jnp.float32)
        + bo_ref[...])


# --------- Parameters & one-time preparation -----------------------------------

def make_params(key, hidden_size, output_size, vocab_size):
    ks = jax.random.split(key, 9)
    s = 0.1
    return {
        "embedding": s * jax.random.normal(ks[0], (vocab_size, hidden_size), jnp.float32),
        "w_ih": s * jax.random.normal(ks[1], (3 * hidden_size, hidden_size), jnp.float32),
        "w_hh": s * jax.random.normal(ks[2], (3 * hidden_size, hidden_size), jnp.float32),
        "b_ih": s * jax.random.normal(ks[3], (3 * hidden_size,), jnp.float32),
        "b_hh": s * jax.random.normal(ks[4], (3 * hidden_size,), jnp.float32),
        "w_concat": s * jax.random.normal(ks[5], (hidden_size, 2 * hidden_size), jnp.float32),
        "b_concat": s * jax.random.normal(ks[6], (hidden_size,), jnp.float32),
        "w_out": s * jax.random.normal(ks[7], (output_size, hidden_size), jnp.float32),
        "b_out": s * jax.random.normal(ks[8], (output_size,), jnp.float32),
    }


def prepare_weights(params, hidden_size, output_size):
    """One-time weight layout prep (hoisted out of the per-step decode path):
    transpose to (in, out), pad to (8,128)-aligned shapes, cast matmul weights
    to bf16. Biases stay f32 (added post-accumulation)."""
    H, V = hidden_size, output_size
    Hp = _round_up(H, 128)
    # Large TILE_V cuts per-grid-step overhead on the HBM-bound projection;
    # double-buffered (Hp, TILE_V) bf16 slabs stay far below v7x's 64 MiB VMEM.
    TILE_V = min(2048, _round_up(V, 128))
    Vp = _round_up(V, TILE_V)

    def pad_gates(wt):              # (H, 3H) -> (Hp, 3Hp), per-gate blocks r,z,n
        return jnp.concatenate(
            [_pad_to(wt[:, g * H:(g + 1) * H], (Hp, Hp)) for g in range(3)], axis=1)

    def pad_bias_gates(b):          # (3H,) -> (1, 3Hp)
        return jnp.concatenate(
            [_pad_to(b[g * H:(g + 1) * H][None, :], (1, Hp)) for g in range(3)], axis=1)

    w_ih = pad_gates(params["w_ih"].T).astype(jnp.bfloat16)        # (Hp, 3Hp)
    w_hh = pad_gates(params["w_hh"].T).astype(jnp.bfloat16)        # (Hp, 3Hp)
    b_ih = pad_bias_gates(params["b_ih"])                          # (1, 3Hp) f32
    b_hh = pad_bias_gates(params["b_hh"])                          # (1, 3Hp) f32

    wc_t = params["w_concat"].T     # (2H, H): rows = [rnn_output | context]
    wc = jnp.concatenate([_pad_to(wc_t[:H, :], (Hp, Hp)),
                          _pad_to(wc_t[H:, :], (Hp, Hp))],
                         axis=0).astype(jnp.bfloat16)              # (2Hp, Hp)
    bc = _pad_to(params["b_concat"][None, :], (1, Hp))             # (1, Hp) f32

    # TODO(synk): quantize w_out (int8 + per-column scales on v5e/v6e, fp8 e4m3
    # on v7x) to halve the dominant HBM weight stream of the vocab projection.
    wo = _pad_to(params["w_out"].T, (Hp, Vp)).astype(jnp.bfloat16)  # (Hp, Vp)
    bo = _pad_to(params["b_out"][None, :], (1, Vp))                 # (1, Vp) f32

    emb = _pad_to(params["embedding"],
                  (params["embedding"].shape[0], Hp)).astype(jnp.bfloat16)

    return {"H": H, "V": V, "Hp": Hp, "Vp": Vp, "TILE_V": TILE_V,
            "w_ih": w_ih, "w_hh": w_hh, "b_ih": b_ih, "b_hh": b_hh,
            "wc": wc, "bc": bc, "wo": wo, "bo": bo, "emb": emb}


def prepare_encoder(prep, encoder_outputs, batch_size):
    """One-time encoder-memory layout prep (invariant across decode steps):
    (S,B,H) -> (Bp,Sp,Hp) bf16, plus the S tiling used by kernel 1."""
    S = encoder_outputs.shape[0]
    Hp = prep["Hp"]
    Bp = _round_up(batch_size, 16)        # 16 sublanes -> fully packed bf16 vregs
    TILE_S = min(256, _round_up(S, 8))
    grid_s = -(-S // TILE_S)
    Sp = grid_s * TILE_S
    enc = _pad_to(jnp.transpose(encoder_outputs, (1, 0, 2)),
                  (Bp, Sp, Hp)).astype(jnp.bfloat16)
    return {"enc": enc, "S": S, "Bp": Bp, "TILE_S": TILE_S, "grid_s": grid_s}


def pad_hidden(last_hidden, Bp, Hp):
    """(1,B,H) -> padded kernel layout (Bp,Hp) f32 (done once, stays padded)."""
    return _pad_to(last_hidden[0], (Bp, Hp))


def unpad_hidden(h_p, B, H):
    return h_p[:B, :H][None, :, :]


# --------- Decode step ----------------------------------------------------------

def luong_decoder_step(prep, encp, input_step, h_prev_p):
    """input_step: (1,B) int32; h_prev_p: (Bp,Hp) f32 padded hidden state.
    Returns (softmax probs (B,V), new padded hidden (Bp,Hp))."""
    H, V, Hp, Vp = prep["H"], prep["V"], prep["Hp"], prep["Vp"]
    Bp, S, TILE_S, grid_s = encp["Bp"], encp["S"], encp["TILE_S"], encp["grid_s"]
    B = input_step.shape[1]

    # Glue: embedding gather (dropout is identity in eval mode).
    x_bf = _pad_to(prep["emb"][input_step[0]], (Bp, Hp))           # (Bp, Hp) bf16

    # ---- kernel 1: GRU + S-tiled dot-attention + concat-Linear ----
    k1_fp = 2 * (Bp * Hp * 2 + Bp * Hp * 4                 # x, h (double-buffered)
                 + Bp * TILE_S * Hp * 2                    # enc tile
                 + 2 * (Hp * 3 * Hp * 2)                   # w_ih + w_hh
                 + 2 * (3 * Hp * 4)                        # b_ih + b_hh
                 + 2 * Hp * Hp * 2 + Hp * 4                # w_concat + b_concat
                 + Bp * Hp * 2 + Bp * Hp * 4)              # cat, h_new outputs
    k1_fp += (Bp * Hp + 2 * Bp * 128) * 4                  # scratch (acc, m, l)

    cat_bf, h_new_p = pl.pallas_call(
        functools.partial(gru_attn_kernel, seq_len=S, tile_s=TILE_S),
        out_shape=(jax.ShapeDtypeStruct((Bp, Hp), jnp.bfloat16),
                   jax.ShapeDtypeStruct((Bp, Hp), jnp.float32)),
        grid=(grid_s,),
        in_specs=[
            pl.BlockSpec((Bp, Hp), lambda s: (0, 0)),             # x (resident)
            pl.BlockSpec((Bp, Hp), lambda s: (0, 0)),             # h_prev
            pl.BlockSpec((Bp, TILE_S, Hp), lambda s: (0, s, 0)),  # enc S-tile
            pl.BlockSpec((Hp, 3 * Hp), lambda s: (0, 0)),         # w_ih
            pl.BlockSpec((Hp, 3 * Hp), lambda s: (0, 0)),         # w_hh
            pl.BlockSpec((1, 3 * Hp), lambda s: (0, 0)),          # b_ih
            pl.BlockSpec((1, 3 * Hp), lambda s: (0, 0)),          # b_hh
            pl.BlockSpec((2 * Hp, Hp), lambda s: (0, 0)),         # w_concat
            pl.BlockSpec((1, Hp), lambda s: (0, 0)),              # b_concat
        ],
        out_specs=(pl.BlockSpec((Bp, Hp), lambda s: (0, 0)),      # cat (bf16)
                   pl.BlockSpec((Bp, Hp), lambda s: (0, 0))),     # h_new (f32)
        scratch_shapes=[pltpu.VMEM((Bp, 1, 1), jnp.float32),      # m
                        pltpu.VMEM((Bp, 1, 1), jnp.float32),      # l
                        pltpu.VMEM((Bp, 1, Hp), jnp.float32)],    # ctx accumulator
        compiler_params=pltpu.CompilerParams(
            dimension_semantics=("arbitrary",),                   # S is a reduction
            vmem_limit_bytes=_vmem_limit(k1_fp)),
    )(x_bf, h_prev_p, encp["enc"], prep["w_ih"], prep["w_hh"],
      prep["b_ih"], prep["b_hh"], prep["wc"], prep["bc"])

    # ---- kernel 2: output projection tiled over the vocab ----
    TILE_V = prep["TILE_V"]
    k2_fp = 2 * (Bp * Hp * 2 + Hp * TILE_V * 2 + TILE_V * 4 + Bp * TILE_V * 4)
    logits_p = pl.pallas_call(
        vocab_proj_kernel,
        out_shape=jax.ShapeDtypeStruct((Bp, Vp), jnp.float32),
        grid=(Vp // TILE_V,),
        in_specs=[
            pl.BlockSpec((Bp, Hp), lambda j: (0, 0)),
            pl.BlockSpec((Hp, TILE_V), lambda j: (0, j)),
            pl.BlockSpec((1, TILE_V), lambda j: (0, j)),
        ],
        out_specs=pl.BlockSpec((Bp, TILE_V), lambda j: (0, j)),
        compiler_params=pltpu.CompilerParams(
            dimension_semantics=("parallel",),                    # v7x dual-TC shard
            vmem_limit_bytes=_vmem_limit(k2_fp)),
    )(cat_bf, prep["wo"], prep["bo"])

    # Global softmax over the full vocab (normalization must see all V tiles).
    # TODO(synk): emit per-tile row max / sum-exp from kernel 2 and finish the
    # normalization in XLA to skip this extra pass over the logits.
    logits = logits_p[:B, :V]
    probs = jax.nn.softmax(logits, axis=1)
    return probs, h_new_p


# --------- Pure-JAX reference (exact f32 replica of the PyTorch forward) -------

def reference_forward(params, input_step, last_hidden, encoder_outputs):
    H = last_hidden.shape[-1]
    emb = params["embedding"][input_step[0]]
    h = last_hidden[0]
    gi = emb @ params["w_ih"].T + params["b_ih"]
    gh = h @ params["w_hh"].T + params["b_hh"]
    r = jax.nn.sigmoid(gi[:, :H] + gh[:, :H])
    z = jax.nn.sigmoid(gi[:, H:2 * H] + gh[:, H:2 * H])
    n = jnp.tanh(gi[:, 2 * H:] + r * gh[:, 2 * H:])
    h_new = (1.0 - z) * n + z * h
    scores = jnp.einsum("bh,sbh->bs", h_new, encoder_outputs)
    attn = jax.nn.softmax(scores, axis=1)
    context = jnp.einsum("bs,sbh->bh", attn, encoder_outputs)
    concat_in = jnp.concatenate([h_new, context], axis=1)
    concat_out = jnp.tanh(concat_in @ params["w_concat"].T + params["b_concat"])
    logits = concat_out @ params["w_out"].T + params["b_out"]
    out = jax.nn.softmax(logits, axis=1)
    return out, h_new[None]


if __name__ == "__main__":
    B, H, S, V = 2, 32, 8, 64   # batch, hidden_size, src seq len, output_size (vocab)

    key = jax.random.PRNGKey(0)
    kp, k1, k2, k3 = jax.random.split(key, 4)
    params = make_params(kp, hidden_size=H, output_size=V, vocab_size=V)

    input_step = jax.random.randint(k1, (1, B), 0, V, dtype=jnp.int32)       # (1, B)
    last_hidden = jax.random.normal(k2, (1, B, H), jnp.float32)              # (1, B, H)
    encoder_outputs = jax.random.normal(k3, (S, B, H), jnp.float32)          # (S, B, H)

    # One-time prep (hoisted out of the per-step decode path).
    prep = prepare_weights(params, hidden_size=H, output_size=V)
    encp = prepare_encoder(prep, encoder_outputs, batch_size=B)
    h0_p = pad_hidden(last_hidden, encp["Bp"], prep["Hp"])

    decoder_step = jax.jit(lambda tok, hp: luong_decoder_step(prep, encp, tok, hp))

    out, h1_p = decoder_step(input_step, h0_p)   # hidden stays padded across steps
    jax.block_until_ready((out, h1_p))
    hidden = unpad_hidden(h1_p, B, H)            # (1, B, H) module-layout view

    ref_out, ref_hidden = reference_forward(params, input_step, last_hidden, encoder_outputs)
    assert out.shape == (B, V) and hidden.shape == (1, B, H)
    # bf16 weights/activations + approx reciprocal -> bf16-level tolerances.
    assert jnp.allclose(out, ref_out, atol=1e-2, rtol=1e-2), \
        float(jnp.max(jnp.abs(out - ref_out)))
    assert jnp.allclose(hidden, ref_hidden, atol=1e-2, rtol=1e-2), \
        float(jnp.max(jnp.abs(hidden - ref_hidden)))
    assert jnp.allclose(jnp.sum(out, axis=1), 1.0, atol=1e-5)

    print("KERNEL_OK")
</pallas_src>

<mosaic_0001>
module attributes {stable_mosaic.version = 11 : i64} {
  func.func @gru_attn_kernel(%arg0: i32, %arg1: memref<16x128xbf16, #tpu.memory_space<vmem>>, %arg2: memref<16x128xf32, #tpu.memory_space<vmem>>, %arg3: memref<16x8x128xbf16, #tpu.memory_space<vmem>>, %arg4: memref<128x384xbf16, #tpu.memory_space<vmem>>, %arg5: memref<128x384xbf16, #tpu.memory_space<vmem>>, %arg6: memref<1x384xf32, #tpu.memory_space<vmem>>, %arg7: memref<1x384xf32, #tpu.memory_space<vmem>>, %arg8: memref<256x128xbf16, #tpu.memory_space<vmem>>, %arg9: memref<1x128xf32, #tpu.memory_space<vmem>>, %arg10: memref<16x128xbf16, #tpu.memory_space<vmem>>, %arg11: memref<16x128xf32, #tpu.memory_space<vmem>>, %arg12: memref<16x1x1xf32, #tpu.memory_space<vmem>>, %arg13: memref<16x1x1xf32, #tpu.memory_space<vmem>>, %arg14: memref<16x1x128xf32, #tpu.memory_space<vmem>>) attributes {dimension_semantics = [#tpu.dimension_semantics<arbitrary>], iteration_bounds = array<i64: 1>, scalar_prefetch = 0 : i64, scratch_operands = 3 : i64, tpu.core_type = #tpu.core_type<tc>, window_params = [{pipeline_mode = #tpu.pipeline_mode<synchronous>, transform_indices = @transform_0, window_bounds = array<i64: 16, 128>}, {pipeline_mode = #tpu.pipeline_mode<synchronous>, transform_indices = @transform_1, window_bounds = array<i64: 16, 128>}, {transform_indices = @transform_2, window_bounds = array<i64: 16, 8, 128>}, {pipeline_mode = #tpu.pipeline_mode<synchronous>, transform_indices = @transform_3, window_bounds = array<i64: 128, 384>}, {pipeline_mode = #tpu.pipeline_mode<synchronous>, transform_indices = @transform_4, window_bounds = array<i64: 128, 384>}, {pipeline_mode = #tpu.pipeline_mode<synchronous>, transform_indices = @transform_5, window_bounds = array<i64: 1, 384>}, {pipeline_mode = #tpu.pipeline_mode<synchronous>, transform_indices = @transform_6, window_bounds = array<i64: 1, 384>}, {pipeline_mode = #tpu.pipeline_mode<synchronous>, transform_indices = @transform_7, window_bounds = array<i64: 256, 128>}, {pipeline_mode = #tpu.pipeline_mode<synchronous>, transform_indices = @transform_8, window_bounds = array<i64: 1, 128>}, {pipeline_mode = #tpu.pipeline_mode<synchronous>, transform_indices = @transform_9, window_bounds = array<i64: 16, 128>}, {pipeline_mode = #tpu.pipeline_mode<synchronous>, transform_indices = @transform_10, window_bounds = array<i64: 16, 128>}]} {
    %c0_i32 = arith.constant 0 : i32
    %0 = arith.cmpi eq, %arg0, %c0_i32 : i32
    %1 = arith.extui %0 : i1 to i32
    %c0_i32_0 = arith.constant 0 : i32
    %2 = arith.cmpi ne, %1, %c0_i32_0 : i32
    scf.if %2 {
      %c0_30 = arith.constant 0 : index
      %c0_31 = arith.constant 0 : index
      %42 = vector.load %arg1[%c0_30, %c0_31] : memref<16x128xbf16, #tpu.memory_space<vmem>>, vector<16x128xbf16>
      %c0_32 = arith.constant 0 : index
      %c0_33 = arith.constant 0 : index
      %43 = vector.load %arg4[%c0_32, %c0_33] : memref<128x384xbf16, #tpu.memory_space<vmem>>, vector<128x384xbf16>
      %cst_34 = arith.constant dense<0.000000e+00> : vector<16x384xf32>
      %44 = tpu.matmul %42, %43, %cst_34 {dimension_numbers = #tpu.dot_dimension_numbers<[1], [0], [0], [1], [0, 0, 1, 1], [], []>} : vector<16x128xbf16>, vector<128x384xbf16>, vector<16x384xf32> -> vector<16x384xf32>
      %c0_35 = arith.constant 0 : index
      %c0_36 = arith.constant 0 : index
      %45 = vector.load %arg6[%c0_35, %c0_36] : memref<1x384xf32, #tpu.memory_space<vmem>>, vector<1x384xf32>
      %46 = vector.broadcast %45 : vector<1x384xf32> to vector<16x384xf32>
      %47 = arith.addf %44, %46 : vector<16x384xf32>
      %c0_37 = arith.constant 0 : index
      %c0_38 = arith.constant 0 : index
      %48 = vector.load %arg2[%c0_37, %c0_38] : memref<16x128xf32, #tpu.memory_space<vmem>>, vector<16x128xf32>
      %49 = arith.truncf %48 : vector<16x128xf32> to vector<16x128xbf16>
      %c0_39 = arith.constant 0 : index
      %c0_40 = arith.constant 0 : index
      %50 = vector.load %arg5[%c0_39, %c0_40] : memref<128x384xbf16, #tpu.memory_space<vmem>>, vector<128x384xbf16>
      %cst_41 = arith.constant dense<0.000000e+00> : vector<16x384xf32>
      %51 = tpu.matmul %49, %50, %cst_41 {dimension_numbers = #tpu.dot_dimension_numbers<[1], [0], [0], [1], [0, 0, 1, 1], [], []>} : vector<16x128xbf16>, vector<128x384xbf16>, vector<16x384xf32> -> vector<16x384xf32>
      %c0_42 = arith.constant 0 : index
      %c0_43 = arith.constant 0 : index
      %52 = vector.load %arg7[%c0_42, %c0_43] : memref<1x384xf32, #tpu.memory_space<vmem>>, vector<1x384xf32>
      %53 = vector.broadcast %52 : vector<1x384xf32> to vector<16x384xf32>
      %54 = arith.addf %51, %53 : vector<16x384xf32>
      %55 = vector.extract_strided_slice %47 {offsets = [0, 0], sizes = [16, 128], strides = [1, 1]} : vector<16x384xf32> to vector<16x128xf32>
      %56 = vector.extract_strided_slice %54 {offsets = [0, 0], sizes = [16, 128], strides = [1, 1]} : vector<16x384xf32> to vector<16x128xf32>
      %57 = arith.addf %55, %56 : vector<16x128xf32>
      %58 = arith.negf %57 : vector<16x128xf32>
      %59 = math.exp %58 : vector<16x128xf32>
      %cst_44 = arith.constant 1.000000e+00 : f32
      %60 = vector.broadcast %cst_44 : f32 to vector<16x128xf32>
      %61 = arith.addf %60, %59 : vector<16x128xf32>
      %62 = arith.divf %60, %61 : vector<16x128xf32>
      %63 = vector.extract_strided_slice %47 {offsets = [0, 128], sizes = [16, 128], strides = [1, 1]} : vector<16x384xf32> to vector<16x128xf32>
      %64 = vector.extract_strided_slice %54 {offsets = [0, 128], sizes = [16, 128], strides = [1, 1]} : vector<16x384xf32> to vector<16x128xf32>
      %65 = arith.addf %63, %64 : vector<16x128xf32>
      %66 = arith.negf %65 : vector<16x128xf32>
      %67 = math.exp %66 : vector<16x128xf32>
      %cst_45 = arith.constant 1.000000e+00 : f32
      %68 = vector.broadcast %cst_45 : f32 to vector<16x128xf32>
      %69 = arith.addf %68, %67 : vector<16x128xf32>
      %70 = arith.divf %68, %69 : vector<16x128xf32>
      %71 = vector.extract_strided_slice %47 {offsets = [0, 256], sizes = [16, 128], strides = [1, 1]} : vector<16x384xf32> to vector<16x128xf32>
      %72 = vector.extract_strided_slice %54 {offsets = [0, 256], sizes = [16, 128], strides = [1, 1]} : vector<16x384xf32> to vector<16x128xf32>
      %73 = arith.mulf %62, %72 : vector<16x128xf32>
      %74 = arith.addf %71, %73 : vector<16x128xf32>
      %75 = math.tanh %74 : vector<16x128xf32>
      %cst_46 = arith.constant 1.000000e+00 : f32
      %76 = vector.broadcast %cst_46 : f32 to vector<16x128xf32>
      %77 = arith.subf %76, %70 : vector<16x128xf32>
      %78 = arith.mulf %77, %75 : vector<16x128xf32>
      %c0_47 = arith.constant 0 : index
      %c0_48 = arith.constant 0 : index
      %79 = vector.load %arg2[%c0_47, %c0_48] : memref<16x128xf32, #tpu.memory_space<vmem>>, vector<16x128xf32>
      %80 = arith.mulf %70, %79 : vector<16x128xf32>
      %81 = arith.addf %78, %80 : vector<16x128xf32>
      %c0_49 = arith.constant 0 : index
      %c0_50 = arith.constant 0 : index
      %82 = vector.load %arg11[%c0_49, %c0_50] : memref<16x128xf32, #tpu.memory_space<vmem>>, vector<16x128xf32>
      tpu.vector_store %arg11[%c0_49, %c0_50], %81 {strides = array<i32>} : memref<16x128xf32, #tpu.memory_space<vmem>>, vector<16x128xf32>,
      %cst_51 = arith.constant -1.000000e+30 : f32
      %83 = vector.broadcast %cst_51 : f32 to vector<16x1x1xf32>
      %c0_52 = arith.constant 0 : index
      %c0_53 = arith.constant 0 : index
      %c0_54 = arith.constant 0 : index
      %84 = vector.load %arg12[%c0_52, %c0_53, %c0_54] : memref<16x1x1xf32, #tpu.memory_space<vmem>>, vector<16x1x1xf32>
      tpu.vector_store %arg12[%c0_52, %c0_53, %c0_54], %83 {strides = array<i32>} : memref<16x1x1xf32, #tpu.memory_space<vmem>>, vector<16x1x1xf32>,
      %cst_55 = arith.constant 0.000000e+00 : f32
      %85 = vector.broadcast %cst_55 : f32 to vector<16x1x1xf32>
      %c0_56 = arith.constant 0 : index
      %c0_57 = arith.constant 0 : index
      %c0_58 = arith.constant 0 : index
      %86 = vector.load %arg13[%c0_56, %c0_57, %c0_58] : memref<16x1x1xf32, #tpu.memory_space<vmem>>, vector<16x1x1xf32>
      tpu.vector_store %arg13[%c0_56, %c0_57, %c0_58], %85 {strides = array<i32>} : memref<16x1x1xf32, #tpu.memory_space<vmem>>, vector<16x1x1xf32>,
      %cst_59 = arith.constant 0.000000e+00 : f32
      %87 = vector.broadcast %cst_59 : f32 to vector<16x1x128xf32>
      %c0_60 = arith.constant 0 : index
      %c0_61 = arith.constant 0 : index
      %c0_62 = arith.constant 0 : index
      %88 = vector.load %arg14[%c0_60, %c0_61, %c0_62] : memref<16x1x128xf32, #tpu.memory_space<vmem>>, vector<16x1x128xf32>
      tpu.vector_store %arg14[%c0_60, %c0_61, %c0_62], %87 {strides = array<i32>} : memref<16x1x128xf32, #tpu.memory_space<vmem>>, vector<16x1x128xf32>,
    } else {
    }
    %c0 = arith.constant 0 : index
    %c0_1 = arith.constant 0 : index
    %c0_2 = arith.constant 0 : index
    %3 = vector.load %arg3[%c0, %c0_1, %c0_2] : memref<16x8x128xbf16, #tpu.memory_space<vmem>>, vector<16x8x128xbf16>
    %c0_3 = arith.constant 0 : index
    %c0_4 = arith.constant 0 : index
    %4 = vector.load %arg11[%c0_3, %c0_4] : memref<16x128xf32, #tpu.memory_space<vmem>>, vector<16x128xf32>
    %5 = arith.truncf %4 : vector<16x128xf32> to vector<16x128xbf16>
    %6 = vector.shape_cast %5 : vector<16x128xbf16> to vector<16x1x128xbf16>
    "tpu.trace_start"() <{level = 10 : i32, message = "bqh,bsh->bqs"}> : () -> ()
    %cst = arith.constant dense<0.000000e+00> : vector<16x1x8xf32>
    %7 = tpu.matmul %6, %3, %cst {dimension_numbers = #tpu.dot_dimension_numbers<[2], [2], [1], [1], [0, 0, 0, 1, 1, 1], [0], [0]>} : vector<16x1x128xbf16>, vector<16x8x128xbf16>, vector<16x1x8xf32> -> vector<16x1x8xf32>
    "tpu.trace_stop"() : () -> ()
    %c8_i32 = arith.constant 8 : i32
    %8 = arith.muli %arg0, %c8_i32 : i32
    %9 = tpu.iota {dimensions = array<i32: 2>} : vector<16x1x8xi32>
    %10 = vector.broadcast %8 : i32 to vector<16x1x8xi32>
    %11 = arith.addi %10, %9 : vector<16x1x8xi32>
    %c8_i32_5 = arith.constant 8 : i32
    %12 = vector.broadcast %c8_i32_5 : i32 to vector<16x1x8xi32>
    %13 = arith.cmpi slt, %11, %12 : vector<16x1x8xi32>
    %cst_6 = arith.constant -1.000000e+30 : f32
    %14 = vector.broadcast %cst_6 : f32 to vector<16x1x8xf32>
    %15 = arith.select %13, %7, %14 : vector<16x1x8xi1>, vector<16x1x8xf32>
    %c0_7 = arith.constant 0 : index
    %c0_8 = arith.constant 0 : index
    %c0_9 = arith.constant 0 : index
    %16 = vector.load %arg12[%c0_7, %c0_8, %c0_9] : memref<16x1x1xf32, #tpu.memory_space<vmem>>, vector<16x1x1xf32>
    %cst_10 = arith.constant dense<0xFF800000> : vector<16x1xf32>
    %17 = vector.multi_reduction <maximumf>, %15, %cst_10 [2] : vector<16x1x8xf32> to vector<16x1xf32>
    %18 = vector.shape_cast %17 : vector<16x1xf32> to vector<16x1x1xf32>
    %19 = arith.maximumf %16, %18 : vector<16x1x1xf32>
    %20 = arith.subf %16, %19 : vector<16x1x1xf32>
    %21 = math.exp %20 : vector<16x1x1xf32>
    %22 = vector.broadcast %19 : vector<16x1x1xf32> to vector<16x1x8xf32>
    %23 = arith.subf %15, %22 : vector<16x1x8xf32>
    %24 = math.exp %23 : vector<16x1x8xf32>
    %c0_11 = arith.constant 0 : index
    %c0_12 = arith.constant 0 : index
    %c0_13 = arith.constant 0 : index
    %25 = vector.load %arg13[%c0_11, %c0_12, %c0_13] : memref<16x1x1xf32, #tpu.memory_space<vmem>>, vector<16x1x1xf32>
    %26 = arith.mulf %21, %25 : vector<16x1x1xf32>
    %cst_14 = arith.constant dense<0.000000e+00> : vector<16x1xf32>
    %27 = vector.multi_reduction <add>, %24, %cst_14 [2] : vector<16x1x8xf32> to vector<16x1xf32>
    %28 = vector.shape_cast %27 : vector<16x1xf32> to vector<16x1x1xf32>
    %29 = arith.addf %26, %28 : vector<16x1x1xf32>
    %c0_15 = arith.constant 0 : index
    %c0_16 = arith.constant 0 : index
    %c0_17 = arith.constant 0 : index
    %30 = vector.load %arg13[%c0_15, %c0_16, %c0_17] : memref<16x1x1xf32, #tpu.memory_space<vmem>>, vector<16x1x1xf32>
    tpu.vector_store %arg13[%c0_15, %c0_16, %c0_17], %29 {strides = array<i32>} : memref<16x1x1xf32, #tpu.memory_space<vmem>>, vector<16x1x1xf32>,
    %c0_18 = arith.constant 0 : index
    %c0_19 = arith.constant 0 : index
    %c0_20 = arith.constant 0 : index
    %31 = vector.load %arg14[%c0_18, %c0_19, %c0_20] : memref<16x1x128xf32, #tpu.memory_space<vmem>>, vector<16x1x128xf32>
    %32 = vector.broadcast %21 : vector<16x1x1xf32> to vector<16x1x128xf32>
    %33 = arith.mulf %32, %31 : vector<16x1x128xf32>
    %34 = arith.truncf %24 : vector<16x1x8xf32> to vector<16x1x8xbf16>
    "tpu.trace_start"() <{level = 10 : i32, message = "bqs,bsh->bqh"}> : () -> ()
    %cst_21 = arith.constant dense<0.000000e+00> : vector<16x1x128xf32>
    %35 = tpu.matmul %34, %3, %cst_21 {dimension_numbers = #tpu.dot_dimension_numbers<[2], [1], [1], [2], [0, 0, 0, 1, 1, 2], [0], [0]>} : vector<16x1x8xbf16>, vector<16x8x128xbf16>, vector<16x1x128xf32> -> vector<16x1x128xf32>
    "tpu.trace_stop"() : () -> ()
    %36 = arith.addf %33, %35 : vector<16x1x128xf32>
    %c0_22 = arith.constant 0 : index
    %c0_23 = arith.constant 0 : index
    %c0_24 = arith.constant 0 : index
    %37 = vector.load %arg14[%c0_22, %c0_23, %c0_24] : memref<16x1x128xf32, #tpu.memory_space<vmem>>, vector<16x1x128xf32>
    tpu.vector_store %arg14[%c0_22, %c0_23, %c0_24], %36 {strides = array<i32>} : memref<16x1x128xf32, #tpu.memory_space<vmem>>, vector<16x1x128xf32>,
    %c0_25 = arith.constant 0 : index
    %c0_26 = arith.constant 0 : index
    %c0_27 = arith.constant 0 : index
    %38 = vector.load %arg12[%c0_25, %c0_26, %c0_27] : memref<16x1x1xf32, #tpu.memory_space<vmem>>, vector<16x1x1xf32>
    tpu.vector_store %arg12[%c0_25, %c0_26, %c0_27], %19 {strides = array<i32>} : memref<16x1x1xf32, #tpu.memory_space<vmem>>, vector<16x1x1xf32>,
    %c0_i32_28 = arith.constant 0 : i32
    %39 = arith.cmpi eq, %arg0, %c0_i32_28 : i32
    %40 = arith.extui %39 : i1 to i32
    %c0_i32_29 = arith.constant 0 : i32
    %41 = arith.cmpi ne, %40, %c0_i32_29 : i32
    scf.if %41 {
      %c0_30 = arith.constant 0 : index
      %c0_31 = arith.constant 0 : index
      %c0_32 = arith.constant 0 : index
      %42 = vector.load %arg14[%c0_30, %c0_31, %c0_32] : memref<16x1x128xf32, #tpu.memory_space<vmem>>, vector<16x1x128xf32>
      %c0_33 = arith.constant 0 : index
      %c0_34 = arith.constant 0 : index
      %c0_35 = arith.constant 0 : index
      %43 = vector.load %arg13[%c0_33, %c0_34, %c0_35] : memref<16x1x1xf32, #tpu.memory_space<vmem>>, vector<16x1x1xf32>
      %44 = tpu.reciprocal %43 {approx = true} : vector<16x1x1xf32> -> vector<16x1x1xf32>
      %45 = vector.broadcast %44 : vector<16x1x1xf32> to vector<16x1x128xf32>
      %46 = arith.mulf %42, %45 : vector<16x1x128xf32>
      %47 = vector.shape_cast %46 : vector<16x1x128xf32> to vector<16x128xf32>
      %c0_36 = arith.constant 0 : index
      %c0_37 = arith.constant 0 : index
      %48 = vector.load %arg11[%c0_36, %c0_37] : memref<16x128xf32, #tpu.memory_space<vmem>>, vector<16x128xf32>
      %49 = tpu.concatenate %48, %47 in 1 : vector<16x128xf32>, vector<16x128xf32> -> vector<16x256xf32>
      %50 = arith.truncf %49 : vector<16x256xf32> to vector<16x256xbf16>
      %c0_38 = arith.constant 0 : index
      %c0_39 = arith.constant 0 : index
      %51 = vector.load %arg8[%c0_38, %c0_39] : memref<256x128xbf16, #tpu.memory_space<vmem>>, vector<256x128xbf16>
      %cst_40 = arith.constant dense<0.000000e+00> : vector<16x128xf32>
      %52 = tpu.matmul %50, %51, %cst_40 {dimension_numbers = #tpu.dot_dimension_numbers<[1], [0], [0], [1], [0, 0, 1, 1], [], []>} : vector<16x256xbf16>, vector<256x128xbf16>, vector<16x128xf32> -> vector<16x128xf32>
      %c0_41 = arith.constant 0 : index
      %c0_42 = arith.constant 0 : index
      %53 = vector.load %arg9[%c0_41, %c0_42] : memref<1x128xf32, #tpu.memory_space<vmem>>, vector<1x128xf32>
      %54 = vector.broadcast %53 : vector<1x128xf32> to vector<16x128xf32>
      %55 = arith.addf %52, %54 : vector<16x128xf32>
      %56 = math.tanh %55 : vector<16x128xf32>
      %57 = arith.truncf %56 : vector<16x128xf32> to vector<16x128xbf16>
      %c0_43 = arith.constant 0 : index
      %c0_44 = arith.constant 0 : index
      %58 = vector.load %arg10[%c0_43, %c0_44] : memref<16x128xbf16, #tpu.memory_space<vmem>>, vector<16x128xbf16>
      tpu.vector_store %arg10[%c0_43, %c0_44], %57 {strides = array<i32>} : memref<16x128xbf16, #tpu.memory_space<vmem>>, vector<16x128xbf16>,
    } else {
    }
    return
  }
  func.func @transform_0(%arg0: i32) -> (i32, i32) {
    %c0_i32 = arith.constant 0 : i32
    %c0_i32_0 = arith.constant 0 : i32
    %c0_i32_1 = arith.constant 0 : i32
    return %c0_i32, %c0_i32_0 : i32, i32
  }
  func.func @transform_1(%arg0: i32) -> (i32, i32) {
    %c0_i32 = arith.constant 0 : i32
    %c0_i32_0 = arith.constant 0 : i32
    %c0_i32_1 = arith.constant 0 : i32
    return %c0_i32, %c0_i32_0 : i32, i32
  }
  func.func @transform_2(%arg0: i32) -> (i32, i32, i32) {
    %c0_i32 = arith.constant 0 : i32
    %c0_i32_0 = arith.constant 0 : i32
    %c0_i32_1 = arith.constant 0 : i32
    return %c0_i32, %arg0, %c0_i32_0 : i32, i32, i32
  }
  func.func @transform_3(%arg0: i32) -> (i32, i32) {
    %c0_i32 = arith.constant 0 : i32
    %c0_i32_0 = arith.constant 0 : i32
    %c0_i32_1 = arith.constant 0 : i32
    return %c0_i32, %c0_i32_0 : i32, i32
  }
  func.func @transform_4(%arg0: i32) -> (i32, i32) {
    %c0_i32 = arith.constant 0 : i32
    %c0_i32_0 = arith.constant 0 : i32
    %c0_i32_1 = arith.constant 0 : i32
    return %c0_i32, %c0_i32_0 : i32, i32
  }
  func.func @transform_5(%arg0: i32) -> (i32, i32) {
    %c0_i32 = arith.constant 0 : i32
    %c0_i32_0 = arith.constant 0 : i32
    %c0_i32_1 = arith.constant 0 : i32
    return %c0_i32, %c0_i32_0 : i32, i32
  }
  func.func @transform_6(%arg0: i32) -> (i32, i32) {
    %c0_i32 = arith.constant 0 : i32
    %c0_i32_0 = arith.constant 0 : i32
    %c0_i32_1 = arith.constant 0 : i32
    return %c0_i32, %c0_i32_0 : i32, i32
  }
  func.func @transform_7(%arg0: i32) -> (i32, i32) {
    %c0_i32 = arith.constant 0 : i32
    %c0_i32_0 = arith.constant 0 : i32
    %c0_i32_1 = arith.constant 0 : i32
    return %c0_i32, %c0_i32_0 : i32, i32
  }
  func.func @transform_8(%arg0: i32) -> (i32, i32) {
    %c0_i32 = arith.constant 0 : i32
    %c0_i32_0 = arith.constant 0 : i32
    %c0_i32_1 = arith.constant 0 : i32
    return %c0_i32, %c0_i32_0 : i32, i32
  }
  func.func @transform_9(%arg0: i32) -> (i32, i32) {
    %c0_i32 = arith.constant 0 : i32
    %c0_i32_0 = arith.constant 0 : i32
    %c0_i32_1 = arith.constant 0 : i32
    return %c0_i32, %c0_i32_0 : i32, i32
  }
  func.func @transform_10(%arg0: i32) -> (i32, i32) {
    %c0_i32 = arith.constant 0 : i32
    %c0_i32_0 = arith.constant 0 : i32
    %c0_i32_1 = arith.constant 0 : i32
    return %c0_i32, %c0_i32_0 : i32, i32
  }
}

module attributes {stable_mosaic.version = 11 : i64} {
  func.func @vocab_proj_kernel(%arg0: i32, %arg1: memref<16x128xbf16, #tpu.memory_space<vmem>>, %arg2: memref<128x128xbf16, #tpu.memory_space<vmem>>, %arg3: memref<1x128xf32, #tpu.memory_space<vmem>>, %arg4: memref<16x128xf32, #tpu.memory_space<vmem>>) attributes {dimension_semantics = [#tpu.dimension_semantics<parallel>], iteration_bounds = array<i64: 1>, scalar_prefetch = 0 : i64, scratch_operands = 0 : i64, tpu.core_type = #tpu.core_type<tc>, window_params = [{pipeline_mode = #tpu.pipeline_mode<synchronous>, transform_indices = @transform_0, window_bounds = array<i64: 16, 128>}, {transform_indices = @transform_1, window_bounds = array<i64: 128, 128>}, {transform_indices = @transform_2, window_bounds = array<i64: 1, 128>}, {transform_indices = @transform_3, window_bounds = array<i64: 16, 128>}]} {
    %c0 = arith.constant 0 : index
    %c0_0 = arith.constant 0 : index
    %0 = vector.load %arg1[%c0, %c0_0] : memref<16x128xbf16, #tpu.memory_space<vmem>>, vector<16x128xbf16>
    %c0_1 = arith.constant 0 : index
    %c0_2 = arith.constant 0 : index
    %1 = vector.load %arg2[%c0_1, %c0_2] : memref<128x128xbf16, #tpu.memory_space<vmem>>, vector<128x128xbf16>
    %cst = arith.constant dense<0.000000e+00> : vector<16x128xf32>
    %2 = tpu.matmul %0, %1, %cst {dimension_numbers = #tpu.dot_dimension_numbers<[1], [0], [0], [1], [0, 0, 1, 1], [], []>} : vector<16x128xbf16>, vector<128x128xbf16>, vector<16x128xf32> -> vector<16x128xf32>
    %c0_3 = arith.constant 0 : index
    %c0_4 = arith.constant 0 : index
    %3 = vector.load %arg3[%c0_3, %c0_4] : memref<1x128xf32, #tpu.memory_space<vmem>>, vector<1x128xf32>
    %4 = vector.broadcast %3 : vector<1x128xf32> to vector<16x128xf32>
    %5 = arith.addf %2, %4 : vector<16x128xf32>
    %c0_5 = arith.constant 0 : index
    %c0_6 = arith.constant 0 : index
    %6 = vector.load %arg4[%c0_5, %c0_6] : memref<16x128xf32, #tpu.memory_space<vmem>>, vector<16x128xf32>
    tpu.vector_store %arg4[%c0_5, %c0_6], %5 {strides = array<i32>} : memref<16x128xf32, #tpu.memory_space<vmem>>, vector<16x128xf32>,
    return
  }
  func.func @transform_0(%arg0: i32) -> (i32, i32) {
    %c0_i32 = arith.constant 0 : i32
    %c0_i32_0 = arith.constant 0 : i32
    %c0_i32_1 = arith.constant 0 : i32
    return %c0_i32, %c0_i32_0 : i32, i32
  }
  func.func @transform_1(%arg0: i32) -> (i32, i32) {
    %c0_i32 = arith.constant 0 : i32
    %c0_i32_0 = arith.constant 0 : i32
    return %c0_i32, %arg0 : i32, i32
  }
  func.func @transform_2(%arg0: i32) -> (i32, i32) {
    %c0_i32 = arith.constant 0 : i32
    %c0_i32_0 = arith.constant 0 : i32
    return %c0_i32, %arg0 : i32, i32
  }
  func.func @transform_3(%arg0: i32) -> (i32, i32) {
    %c0_i32 = arith.constant 0 : i32
    %c0_i32_0 = arith.constant 0 : i32
    return %c0_i32, %arg0 : i32, i32
  }
}

</mosaic_0001>

<bundles_post_ra>
// kernel: _lambda_.3
= control target key start
LH: loop header
LB: loop body
LE: loop exit
PB: predicated region body
PF: predicated region fallthrough
CT: control target
= control target key end

     0   :  { %v191_v0 = vmov 0.0   ;;  %vm192_vm0 = vmmov 0   ;;  %s249_s1 = inlined_call_operand.vmem [shape: bf16[128,128], index: 1, kind: input, shape index: {}]   ;;  %s250_s0 = inlined_call_operand.vmem [shape: bf16[16,128], index: 0, kind: input, shape index: {}]   ;;  %s251_s2 = inlined_call_operand.vmem [shape: f32[1,128], index: 2, kind: input, shape index: {}]   ;;  %s252_s3 = inlined_call_operand.vmem [shape: f32[16,128], index: 3, kind: output, shape index: {}]  }
   0x1   :  { %160 = vmatprep.subr.bf16.mxu0 %v191_v0  ;;  %v182_v1 = vld [vmem:[%s249_s1] sm:$0xff]   ;;  %176 = vmatprep.mubr.msk.bf16.mxu0 %vm192_vm0, %v191_v0  ;;  %v183_v2 = vld [vmem:[%s249_s1 + $0x8] sm:$0xff]   ;;  %v184_v3 = vld [vmem:[%s249_s1 + $0x10] sm:$0xff]  }
   0x2   :  { %161 = vmatpush3.bf16.msra.mxu0 %v182_v1  ;;  %v185_v4 = vld [vmem:[%s249_s1 + $0x18] sm:$0xff]   ;;  %v186_v5 = vld [vmem:[%s249_s1 + $0x20] sm:$0xff]   ;;  %v187_v6 = vld [vmem:[%s249_s1 + $0x28] sm:$0xff]  }
   0x3   :  { %162 = vmatprep.subr.bf16.mxu0 %v191_v0  ;;  %v188_v7 = vld [vmem:[%s249_s1 + $0x30] sm:$0xff]   ;;  %v189_v8 = vld [vmem:[%s249_s1 + $0x38] sm:$0xff]   ;;  %v190_v9 = vld [vmem:[%s250_s0] sm:$0xff]  }
   0x4   :  { %v141_v10 = vld [vmem:[%s251_s2] ss:$0 sm:$0xff] }
   0x6   :  { %163 = vmatpush3.bf16.msra.mxu0 %v183_v2 }
   0x7   :  { %164 = vmatprep.subr.bf16.mxu0 %v191_v0 }
   0xa   :  { %165 = vmatpush3.bf16.msra.mxu0 %v184_v3 }
   0xb   :  { %166 = vmatprep.subr.bf16.mxu0 %v191_v0 }
   0xe   :  { %167 = vmatpush3.bf16.msra.mxu0 %v185_v4 }
   0xf   :  { %168 = vmatprep.subr.bf16.mxu0 %v191_v0 }
  0x12   :  { %169 = vmatpush3.bf16.msra.mxu0 %v186_v5 }
  0x13   :  { %170 = vmatprep.subr.bf16.mxu0 %v191_v0 }
  0x16   :  { %171 = vmatpush3.bf16.msra.mxu0 %v187_v6 }
  0x17   :  { %172 = vmatprep.subr.bf16.mxu0 %v191_v0 }
  0x1a   :  { %173 = vmatpush3.bf16.msra.mxu0 %v188_v7 }
  0x1b   :  { %174 = vmatprep.subr.bf16.mxu0 %v191_v0 }
  0x1e   :  { %175 = vmatpush3.bf16.msra.mxu0 %v189_v8 }
  0x21   :  { %177 = vmatmul.mubr.bf16.vlgmr.msra.gmra.mrb[0].mxu0 %v190_v9 }
  0xf4   :  { %v128_v11 = vpop.f32.mrb[0].mxu0 }
  0xf5   :  { %v129_v12 = vadd.f32 %v141_v10, %v128_v11  ;;  %v178_v13 = vpop.f32.mrb[1].mxu0 }
  0xf6   :  { %v131_v14 = vpop.f32.mrb[2].mxu0 }
  0xf7   :  { %135 = vst [vmem:[%s252_s3] sm:$0xff] %v129_v12  ;;  %v132_v15 = vadd.f32 %v141_v10, %v131_v14  ;;  %v179_v16 = vpop.f32.mrb[3].mxu0 }
  0xf9   :  { %136 = vst [vmem:[%s252_s3 + $0x8] sm:$0xff] %v132_v15 }

// kernel: _lambda_.2
= control target key start
LH: loop header
LB: loop body
LE: loop exit
PB: predicated region body
PF: predicated region fallthrough
CT: control target
= control target key end

     0   :  { %v5300_v2 = vmov 0.0   ;;  %v4148_v3 = vmov 0   ;;  %vm4149_vm0 = vmmov 0   ;;  %s5289_s0 = inlined_call_operand.vmem [shape: bf16[16,128], index: 0, kind: input, shape index: {}]   ;;  %s5290_s1 = inlined_call_operand.vmem [shape: f32[16,128], index: 1, kind: input, shape index: {}]   ;;  %s5291_s2 = inlined_call_operand.vmem [shape: bf16[16,8,128], index: 2, kind: input, shape index: {}]   ;;  %s5292_s3 = inlined_call_operand.vmem [shape: bf16[128,384], index: 3, kind: input, shape index: {}]   ;;  %s5293_s4 = inlined_call_operand.vmem [shape: bf16[128,384], index: 4, kind: input, shape index: {}]   ;;  %s5294_s5 = inlined_call_operand.vmem [shape: f32[1,384], index: 5, kind: input, shape index: {}]   ;;  %s5295_s6 = inlined_call_operand.vmem [shape: f32[1,384], index: 6, kind: input, shape index: {}]   ;;  %s5296_s7 = inlined_call_operand.vmem [shape: bf16[256,128], index: 7, kind: input, shape index: {}]   ;;  %s5297_s8 = inlined_call_operand.vmem [shape: f32[1,128], index: 8, kind: input, shape index: {}]   ;;  %s5298_s9 = inlined_call_operand.vmem [shape: bf16[16,128], index: 9, kind: output, shape index: {0}]   ;;  %s5299_s10 = inlined_call_operand.hbm [shape: f32[16,128], index: 10, kind: output, shape index: {1}]  }
   0x1   :  { %v3922_v0 = vld [vmem:[%s5292_s3 + $0x4] ss:$12 sps:$4 sm:$0xff]   ;;  %v3924_v1 = vld [vmem:[%s5292_s3] ss:$12 sps:$4 sm:$0xff]   ;;  %3668 = vmatprep.subr.bf16.mxu1 %v5300_v2  ;;  %650 = vst [vmem:[#allocation4] sm:$0x1] %v5300_v2  ;;  %257 = vmatprep.mubr.bf16.mxu0 %v4148_v3 }
   0x2   :  { %651 = vst [vmem:[#allocation4 + $0x1] sm:$0x1] %v5300_v2  ;;  %652 = vst [vmem:[#allocation4 + $0x2] sm:$0x1] %v5300_v2  ;;  %225 = vmatprep.subr.bf16.mxu0 %v3922_v0  ;;  %v3925_v4 = vld [vmem:[%s5292_s3 + $0x1c] ss:$12 sps:$4 sm:$0xff]   ;;  %3684 = vmatprep.mubr.msk.bf16.mxu1 %vm4149_vm0, %v5300_v2 }
   0x3   :  { %653 = vst [vmem:[#allocation4 + $0x3] sm:$0x1] %v5300_v2  ;;  %654 = vst [vmem:[#allocation4 + $0x4] sm:$0x1] %v5300_v2  ;;  %226 = vmatpush1.bf16.msra.mxu0 %v3924_v1  ;;  %v3927_v5 = vld [vmem:[%s5292_s3 + $0x18] ss:$12 sps:$4 sm:$0xff]   ;;  %3920 = vset.pattern.permute.xlu0 %v4148_v3 }
   0x4   :  { %655 = vst [vmem:[#allocation4 + $0x5] sm:$0x1] %v5300_v2  ;;  %656 = vst [vmem:[#allocation4 + $0x6] sm:$0x1] %v5300_v2  ;;  %227 = vmatprep.subr.bf16.mxu0 %v3925_v4  ;;  %v3928_v6 = vld [vmem:[%s5292_s3 + $0x34] ss:$12 sps:$4 sm:$0xff]   ;;  %3921 = vset.pattern.permute.xlu1 %v4148_v3 }
   0x5   :  { %657 = vst [vmem:[#allocation4 + $0x7] sm:$0x1] %v5300_v2  ;;  %658 = vst [vmem:[#allocation4 + $0x8] sm:$0x1] %v5300_v2  ;;  %v3930_v7 = vld [vmem:[%s5292_s3 + $0x30] ss:$12 sps:$4 sm:$0xff]  }
   0x6   :  { %659 = vst [vmem:[#allocation4 + $0x9] sm:$0x1] %v5300_v2  ;;  %660 = vst [vmem:[#allocation4 + $0xa] sm:$0x1] %v5300_v2  ;;  %v3931_v8 = vld [vmem:[%s5292_s3 + $0x4c] ss:$12 sps:$4 sm:$0xff]  }
   0x7   :  { %661 = vst [vmem:[#allocation4 + $0xb] sm:$0x1] %v5300_v2  ;;  %662 = vst [vmem:[#allocation4 + $0xc] sm:$0x1] %v5300_v2  ;;  %228 = vmatpush1.bf16.msra.mxu0 %v3927_v5  ;;  %v3942_v9 = vld [vmem:[%s5292_s3 + $0x8] ss:$12 sps:$4 sm:$0xff]  }
   0x8   :  { %663 = vst [vmem:[#allocation4 + $0xd] sm:$0x1] %v5300_v2  ;;  %664 = vst [vmem:[#allocation4 + $0xe] sm:$0x1] %v5300_v2  ;;  %229 = vmatprep.subr.bf16.mxu0 %v3928_v6  ;;  %v3933_v10 = vld [vmem:[%s5292_s3 + $0x48] ss:$12 sps:$4 sm:$0xff]   ;;  %3669 = vmatpush3.bf16.msra.mxu1 %v3942_v9 }
   0x9   :  { %665 = vst [vmem:[#allocation4 + $0xf] sm:$0x1] %v5300_v2  ;;  %v3934_v11 = vld [vmem:[%s5292_s3 + $0x64] ss:$12 sps:$4 sm:$0xff]   ;;  %3670 = vmatprep.subr.bf16.mxu1 %v5300_v2  ;;  %v3946_v12 = vld [vmem:[%s5292_s3 + $0x20] ss:$12 sps:$4 sm:$0xff]  }
   0xa   :  { %v3936_v13 = vld [vmem:[%s5292_s3 + $0x60] ss:$12 sps:$4 sm:$0xff]   ;;  %v3948_v14 = vld [vmem:[%s5292_s3 + $0x38] ss:$12 sps:$4 sm:$0xff]   ;;  %v3937_v15 = vld [vmem:[%s5292_s3 + $0x7c] ss:$12 sps:$4 sm:$0xff]  }
   0xb   :  { %230 = vmatpush1.bf16.msra.mxu0 %v3930_v7  ;;  %v3939_v16 = vld [vmem:[%s5292_s3 + $0x78] ss:$12 sps:$4 sm:$0xff]   ;;  %v3953_v17 = vld [vmem:[%s5292_s3 + $0x50] ss:$12 sps:$4 sm:$0xff]   ;;  %v3940_v18 = vld [vmem:[%s5292_s3 + $0x94] ss:$12 sps:$4 sm:$0xff]  }
   0xc   :  { %231 = vmatprep.subr.bf16.mxu0 %v3931_v8  ;;  %3671 = vmatpush3.bf16.msra.mxu1 %v3946_v12  ;;  %v3943_v19 = vld [vmem:[%s5292_s3 + $0x90] ss:$12 sps:$4 sm:$0xff]   ;;  %v3957_v20 = vld [vmem:[%s5292_s3 + $0x68] ss:$12 sps:$4 sm:$0xff]   ;;  %v3944_v21 = vld [vmem:[%s5292_s3 + $0xac] ss:$12 sps:$4 sm:$0xff]  }
   0xd   :  { %3672 = vmatprep.subr.bf16.mxu1 %v5300_v2  ;;  %v3947_v22 = vld [vmem:[%s5292_s3 + $0xa8] ss:$12 sps:$4 sm:$0xff]   ;;  %v3961_v23 = vld [vmem:[%s5292_s3 + $0x80] ss:$12 sps:$4 sm:$0xff]   ;;  %v3951_v24 = vld [vmem:[%s5293_s4 + $0x4] ss:$12 sps:$4 sm:$0xff]  }
   0xe   :  { %v3949_v25 = vld [vmem:[%s5293_s4] ss:$12 sps:$4 sm:$0xff]   ;;  %v3965_v27 = vld [vmem:[%s5292_s3 + $0x98] ss:$12 sps:$4 sm:$0xff]   ;;  %v3956_v28 = vld [vmem:[%s5293_s4 + $0x1c] ss:$12 sps:$4 sm:$0xff]  }
   0xf   :  { %232 = vmatpush1.bf16.msra.mxu0 %v3933_v10  ;;  %v3952_v26 = vld [vmem:[%s5289_s0] sm:$0xff]   ;;  %v3969_v30 = vld [vmem:[%s5292_s3 + $0xb0] ss:$12 sps:$4 sm:$0xff]   ;;  %v3964_v33 = vld [vmem:[%s5293_s4 + $0x4c] ss:$12 sps:$4 sm:$0xff]  }
  0x10   :  { %233 = vmatprep.subr.bf16.mxu0 %v3934_v11  ;;  %3673 = vmatpush3.bf16.msra.mxu1 %v3948_v14  ;;  %v3954_v29 = vld [vmem:[%s5293_s4 + $0x18] ss:$12 sps:$4 sm:$0xff]   ;;  %v3960_v31 = vld [vmem:[%s5293_s4 + $0x34] ss:$12 sps:$4 sm:$0xff]   ;;  %v3958_v32 = vld [vmem:[%s5293_s4 + $0x30] ss:$12 sps:$4 sm:$0xff]  }
  0x11   :  { %3674 = vmatprep.subr.bf16.mxu1 %v5300_v2  ;;  %v3976_v34 = vld [vmem:[%s5293_s4 + $0x8] ss:$12 sps:$4 sm:$0xff]   ;;  %v3980_v36 = vld [vmem:[%s5293_s4 + $0x20] ss:$12 sps:$4 sm:$0xff]   ;;  %v3968_v37 = vld [vmem:[%s5293_s4 + $0x64] ss:$12 sps:$4 sm:$0xff]  }
  0x12   :  { %v3962_v35 = vld [vmem:[%s5293_s4 + $0x48] ss:$12 sps:$4 sm:$0xff]   ;;  %v3966_v38 = vld [vmem:[%s5293_s4 + $0x60] ss:$12 sps:$4 sm:$0xff]   ;;  %v3981_v39 = vld [vmem:[%s5293_s4 + $0x38] ss:$12 sps:$4 sm:$0xff]  }
  0x13   :  { %234 = vmatpush1.bf16.msra.mxu0 %v3936_v13  ;;  %v3972_v40 = vld [vmem:[%s5293_s4 + $0x7c] ss:$12 sps:$4 sm:$0xff]  }
  0x14   :  { %235 = vmatprep.subr.bf16.mxu0 %v3937_v15  ;;  %3675 = vmatpush3.bf16.msra.mxu1 %v3953_v17 }
  0x15   :  { %3676 = vmatprep.subr.bf16.mxu1 %v5300_v2 }
  0x17   :  { %236 = vmatpush1.bf16.msra.mxu0 %v3939_v16 }
  0x18   :  { %237 = vmatprep.subr.bf16.mxu0 %v3940_v18  ;;  %3677 = vmatpush3.bf16.msra.mxu1 %v3957_v20 }
  0x19   :  { %3678 = vmatprep.subr.bf16.mxu1 %v5300_v2 }
  0x1b   :  { %238 = vmatpush1.bf16.msra.mxu0 %v3943_v19 }
  0x1c   :  { %239 = vmatprep.subr.bf16.mxu0 %v3944_v21  ;;  %3679 = vmatpush3.bf16.msra.mxu1 %v3961_v23 }
  0x1d   :  { %3680 = vmatprep.subr.bf16.mxu1 %v5300_v2 }
  0x1f   :  { %240 = vmatpush1.bf16.msra.mxu0 %v3947_v22 }
  0x20   :  { %489 = vmatprep.subr.bf16.mxu0 %v3951_v24  ;;  %3681 = vmatpush3.bf16.msra.mxu1 %v3965_v27 }
  0x21   :  { %3682 = vmatprep.subr.bf16.mxu1 %v5300_v2 }
  0x22   :  { %258 = vmatmul.mubr.bf16.vlgmr.msra.gmra.mrb[0].mxu0 %v3952_v26 }
  0x23   :  { %490 = vmatpush1.bf16.msra.mxu0 %v3949_v25  ;;  %521 = vmatprep.mubr.bf16.mxu0 %v4148_v3 }
  0x24   :  { %491 = vmatprep.subr.bf16.mxu0 %v3956_v28  ;;  %3683 = vmatpush3.bf16.msra.mxu1 %v3969_v30 }
  0x25   :  { %3688 = vmatprep.subr.bf16.mxu1 %v5300_v2 }
  0x27   :  { %492 = vmatpush1.bf16.msra.mxu0 %v3954_v29  ;;  %3685 = vmatmul.mubr.bf16.vlgmr.msra.gmra.mrb[0].mxu1 %v3952_v26 }
  0x28   :  { %493 = vmatprep.subr.bf16.mxu0 %v3960_v31  ;;  %3689 = vmatpush3.bf16.msra.mxu1 %v3976_v34 }
  0x29   :  { %3690 = vmatprep.subr.bf16.mxu1 %v5300_v2  ;;  %3704 = vmatprep.mubr.msk.bf16.mxu1 %vm4149_vm0, %v5300_v2 }
  0x2b   :  { %494 = vmatpush1.bf16.msra.mxu0 %v3958_v32 }
  0x2c   :  { %495 = vmatprep.subr.bf16.mxu0 %v3964_v33  ;;  %3691 = vmatpush3.bf16.msra.mxu1 %v3980_v36 }
  0x2d   :  { %3692 = vmatprep.subr.bf16.mxu1 %v5300_v2 }
  0x2f   :  { %496 = vmatpush1.bf16.msra.mxu0 %v3962_v35 }
  0x30   :  { %497 = vmatprep.subr.bf16.mxu0 %v3968_v37 }
  0x31   :  { %16 = vsyncpa [#allocation6], 0  ;;  %v3970_v41 = vld [vmem:[%s5293_s4 + $0x78] ss:$12 sps:$4 sm:$0xff]   ;;  %3693 = vmatpush3.bf16.msra.mxu1 %v3981_v39  ;;  %v3982_v42 = vld [vmem:[%s5293_s4 + $0x50] ss:$12 sps:$4 sm:$0xff]   ;;  %v76_v60 = vlaneseq }
  0x32   :  { %v3975_v43 = vld [vmem:[%s5293_s4 + $0x94] ss:$12 sps:$4 sm:$0xff]   ;;  %3694 = vmatprep.subr.bf16.mxu1 %v5300_v2  ;;  %v3973_v44 = vld [vmem:[%s5293_s4 + $0x90] ss:$12 sps:$4 sm:$0xff]   ;;  %v3979_v46 = vld [vmem:[%s5293_s4 + $0xac] ss:$12 sps:$4 sm:$0xff]  }
  0x33   :  { %498 = vmatpush1.bf16.msra.mxu0 %v3966_v38  ;;  %v3983_v45 = vld [vmem:[%s5293_s4 + $0x68] ss:$12 sps:$4 sm:$0xff]   ;;  %v4388_v48 = vld [vmem:[%s5290_s1] sm:$0xff]  ;;  %v3986_v53 = vld [vmem:[%s5293_s4 + $0xb0] ss:$12 sps:$4 sm:$0xff]   ;;  %v4430_v61 = vshrl.u32 %v76_v60, 7 }
  0x34   :  { %499 = vmatprep.subr.bf16.mxu0 %v3972_v40  ;;  %v3977_v47 = vld [vmem:[%s5293_s4 + $0xa8] ss:$12 sps:$4 sm:$0xff]   ;;  %v3984_v50 = vld [vmem:[%s5293_s4 + $0x80] ss:$12 sps:$4 sm:$0xff]   ;;  %v3985_v52 = vld [vmem:[%s5293_s4 + $0x98] ss:$12 sps:$4 sm:$0xff]  }
  0x35   :  { %3695 = vmatpush3.bf16.msra.mxu1 %v3982_v42  ;;  %v4393_v49 = vld [vmem:[%s5290_s1 + $0x8] sm:$0xff]  ;;  %v4418_v54 = vld [vmem:[%s5291_s2] sm:$0xf]  ;;  %v4423_v55 = vld [vmem:[%s5291_s2 + $0x10] sm:$0xf]  ;;  %v4433_v62 = vsub.s32 0, %v4430_v61 }
  0x36   :  { %3696 = vmatprep.subr.bf16.mxu1 %v5300_v2  ;;  %v311_v51 = vpack.c.bf16 %v4393_v49, %v4388_v48  ;;  %v344_v63 = vld [vmem:[%s5295_s6] sm:$0x7]  ;;  %v82_v1 = vsub.s32 1, %v4430_v61  ;;  %v86_v29 = vsub.s32 2, %v4430_v61  ;;  %vm617_vm1 = vcmask 0  }
  0x37   :  { %500 = vmatpush1.bf16.msra.mxu0 %v3970_v41  ;;  %v74_v0 = vld [vmem:[%s5294_s5] sm:$0x7]  ;;  %v349_v4 = vrot.slane %v344_v63, %v4433_v62  ;;  %634 = vst.msk [vmem:[#allocation3] sm:$0x1] %vm617_vm1, %v5300_v2  ;;  %635 = vst.msk [vmem:[#allocation3 + $0x1] sm:$0x1] %vm617_vm1, %v5300_v2 }
  0x38   :  { %501 = vmatprep.subr.bf16.mxu0 %v3975_v43  ;;  %v79_v3 = vrot.slane %v74_v0, %v4433_v62  ;;  %v83_v5 = vrot.slane %v74_v0, %v82_v1  ;;  %v353_v6 = vrot.slane %v344_v63, %v82_v1  ;;  %v357_v30 = vrot.slane %v344_v63, %v86_v29 }
  0x39   :  { %3697 = vmatpush3.bf16.msra.mxu1 %v3983_v45  ;;  %v87_v33 = vrot.slane %v74_v0, %v86_v29  ;;  %636 = vst.msk [vmem:[#allocation3 + $0x2] sm:$0x1] %vm617_vm1, %v5300_v2  ;;  %637 = vst.msk [vmem:[#allocation3 + $0x3] sm:$0x1] %vm617_vm1, %v5300_v2  ;;  %vm1525_vm3 = vcmask 57344   ;;  %vm2139_vm4 = vcmask 1043456  }
  0x3a   :  { %3698 = vmatprep.subr.bf16.mxu1 %v5300_v2  ;;  %v3900_v7 = vadd.f32 %v349_v4, %v79_v3  ;;  %v3902_v9 = vadd.f32 %v353_v6, %v83_v5  ;;  %638 = vst.msk [vmem:[#allocation3 + $0x4] sm:$0x1] %vm617_vm1, %v5300_v2  ;;  %639 = vst.msk [vmem:[#allocation3 + $0x5] sm:$0x1] %vm617_vm1, %v5300_v2  ;;  %vm2135_vm5 = vcmask 64512  }
  0x3b   :  { %502 = vmatpush1.bf16.msra.mxu0 %v3973_v44  ;;  %640 = vst.msk [vmem:[#allocation3 + $0x6] sm:$0x1] %vm617_vm1, %v5300_v2  ;;  %641 = vst.msk [vmem:[#allocation3 + $0x7] sm:$0x1] %vm617_vm1, %v5300_v2 }
  0x3c   :  { %503 = vmatprep.subr.bf16.mxu0 %v3979_v46  ;;  %642 = vst.msk [vmem:[#allocation3 + $0x8] sm:$0x1] %vm617_vm1, %v5300_v2  ;;  %643 = vst.msk [vmem:[#allocation3 + $0x9] sm:$0x1] %vm617_vm1, %v5300_v2 }
  0x3d   :  { %3699 = vmatpush3.bf16.msra.mxu1 %v3984_v50  ;;  %644 = vst.msk [vmem:[#allocation3 + $0xa] sm:$0x1] %vm617_vm1, %v5300_v2  ;;  %645 = vst.msk [vmem:[#allocation3 + $0xb] sm:$0x1] %vm617_vm1, %v5300_v2 }
  0x3e   :  { %3700 = vmatprep.subr.bf16.mxu1 %v5300_v2  ;;  %646 = vst.msk [vmem:[#allocation3 + $0xc] sm:$0x1] %vm617_vm1, %v5300_v2  ;;  %647 = vst.msk [vmem:[#allocation3 + $0xd] sm:$0x1] %vm617_vm1, %v5300_v2 }
  0x3f   :  { %504 = vmatpush1.bf16.msra.mxu0 %v3977_v47  ;;  %v4150_v47 = vmov 1966171168   ;;  %648 = vst.msk [vmem:[#allocation3 + $0xe] sm:$0x1] %vm617_vm1, %v5300_v2  ;;  %649 = vst.msk [vmem:[#allocation3 + $0xf] sm:$0x1] %vm617_vm1, %v5300_v2 }
  0x40   :  { %3732 = vmatprep.subr.bf16.mxu0 %v5300_v2  ;;  %v688_v50 = vunpack.c.l.s4 %v4150_v47 }
  0x41   :  { %3701 = vmatpush3.bf16.msra.mxu1 %v3985_v52 }
  0x42   :  { %522 = vmatmul.mubr.bf16.vlgmr.msra.gmra.mrb[0].mxu0 %v311_v51  ;;  %3702 = vmatprep.subr.bf16.mxu1 %v5300_v2 }
  0x43   :  { %3734 = vmatprep.mubr.msk.bf16.mxu0 %vm4149_vm0, %v5300_v2 }
  0x45   :  { %3703 = vmatpush3.bf16.msra.mxu1 %v3986_v53 }
  0x46   :  { %3708 = vmatprep.subr.bf16.mxu1 %v5300_v2 }
  0x48   :  { %3705 = vmatmul.mubr.bf16.vlgmr.msra.gmra.mrb[4].mxu1 %v311_v51  ;;  %3733 = vmatpush3.bf16.xpose.msra.mxu0 %v4423_v55 }
  0x49   :  { %3710 = vmatprep.mubr.msk.bf16.mxu1 %vm4149_vm0, %v5300_v2  ;;  %3744 = vmatprep.subr.bf16.mxu0 %v5300_v2 }
  0x4e   :  { %3709 = vmatpush3.bf16.xpose.msra.mxu1 %v4418_v54 }
  0x4f   :  { %3714 = vmatprep.subr.bf16.mxu1 %v5300_v2 }
  0xfa   :  { %v302_v56 = vpop.f32.mrb[0].mxu1 }
  0xfb   :  { %v3686_v57 = vpop.f32.mrb[1].mxu1  ;;  %v303_v38 = vadd.f32 %v302_v56, %v87_v33 }
  0xfc   :  { %v305_v58 = vpop.f32.mrb[2].mxu1  ;;  %v689_v57 = vunpack.c.0.s8 %v688_v50 }
  0xfd   :  { %v3687_v59 = vpop.f32.mrb[3].mxu1  ;;  %v306_v42 = vadd.f32 %v305_v58, %v87_v33  ;;  %v4517_v33 = vld [vmem:[%s5291_s2 + $0x28] sm:$0xf] }
  0xfe   :  { %v4448_v4 = vsub.s32 %v689_v57, %v4430_v61  ;;  %v4459_v61 = vld [vmem:[%s5291_s2 + $0x4] sm:$0xf] }
 0x100   :  { %5316 = vst [vmem:[#allocation8_spill] sm:$0xff] %v4448_v4 }
 0x115   :  { %v523_v8 = vpop.f32.mrb[0].mxu0 }
 0x116   :  { %v3901_v10 = vadd.f32 %v3900_v7, %v523_v8  ;;  %v525_v11 = vpop.f32.mrb[1].mxu0 }
 0x117   :  { %v527_v12 = vpop.f32.mrb[2].mxu0  ;;  %v3903_v16 = vadd.f32 %v3902_v9, %v525_v11 }
 0x118   :  { %v3509_v13 = vmul.f32 -1.442695, %v3901_v10  ;;  %v3905_v14 = vadd.f32 %v3900_v7, %v527_v12  ;;  %v529_v15 = vpop.f32.mrb[3].mxu0 }
 0x119   :  { %v3907_v18 = vadd.f32 %v3902_v9, %v529_v15  ;;  %v3511_v19 = vmul.f32 -1.442695, %v3903_v16  ;;  %v4467_v15 = vld [vmem:[%s5291_s2 + $0x18] sm:$0xf] }
 0x11a   :  { %4003 = vpow2.f32 %v3509_v13  ;;  %v3510_v17 = vmul.f32 -1.442695, %v3905_v14 }
 0x11b   :  { %v566_v20 = vpop.f32.mrb[4].mxu1  ;;  %v3512_v22 = vmul.f32 -1.442695, %v3907_v18 }
 0x11c   :  { %4005 = vpow2.f32 %v3510_v17  ;;  %v3706_v21 = vpop.f32.mrb[5].mxu1  ;;  %v567_v35 = vadd.f32 %v566_v20, %v357_v30 }
 0x11d   :  { %v569_v23 = vpop.f32.mrb[6].mxu1  ;;  %4007 = vpow2.f32 %v3511_v19 }
 0x11e   :  { %v3707_v24 = vpop.f32.mrb[7].mxu1  ;;  %4009 = vpow2.f32 %v3512_v22  ;;  %v570_v40 = vadd.f32 %v569_v23, %v357_v30  ;;  %v4486_v22 = vld [vmem:[%s5291_s2 + $0x8] sm:$0xf]  ;;  %v4511_v30 = vld [vmem:[%s5291_s2 + $0xc] sm:$0xf] }
 0x11f   :  { %v4492_v24 = vld [vmem:[%s5291_s2 + $0x20] sm:$0xf] }
 0x124   :  { %v4004_v25 = vpop.eup %4003 }
 0x125   :  { %v581_v26 = vadd.f32 1.0, %v4004_v25 }
 0x126   :  { %v4006_v27 = vpop.eup %4005 }
 0x127   :  { %4011 = vrcp.f32 %v581_v26  ;;  %v582_v28 = vadd.f32 1.0, %v4006_v27  ;;  %v4008_v31 = vpop.eup %4007 }
 0x128   :  { %v4010_v32 = vpop.eup %4009  ;;  %v595_v34 = vadd.f32 1.0, %v4008_v31 }
 0x129   :  { %4013 = vrcp.f32 %v582_v28  ;;  %v596_v36 = vadd.f32 1.0, %v4010_v32 }
 0x12a   :  { %4015 = vrcp.f32 %v595_v34 }
 0x12b   :  { %4017 = vrcp.f32 %v596_v36 }
 0x131   :  { %v4012_v37 = vpop.eup %4011 }
 0x132   :  { %v601_v39 = vmul.f32 %v4012_v37, %v567_v35 }
 0x133   :  { %v4014_v41 = vpop.eup %4013 }
 0x134   :  { %v603_v43 = vadd.f32 %v601_v39, %v303_v38  ;;  %v602_v44 = vmul.f32 %v4014_v41, %v570_v40  ;;  %v4016_v46 = vpop.eup %4015  ;;  %v4532_v38 = vld [vmem:[%s5291_s2 + $0x14] sm:$0xf]  ;;  %v4539_v41 = vld [vmem:[%s5291_s2 + $0x30] sm:$0xf] }
 0x135   :  { %v4018_v51 = vpop.eup %4017  ;;  %v607_v52 = vsub.f32 1.0, %v4016_v46  ;;  %v611_v56 = vmul.f32 %v4016_v46, %v4388_v48  ;;  %v4555_v46 = vld [vmem:[%s5291_s2 + $0x1c] sm:$0xf] }
 0x136   :  { %4019 = vtanh.f32 %v603_v43  ;;  %v604_v45 = vadd.f32 %v602_v44, %v306_v42  ;;  %v608_v59 = vsub.f32 1.0, %v4018_v51  ;;  %v612_v58 = vmul.f32 %v4018_v51, %v4393_v49  ;;  %v4562_v51 = vld [vmem:[%s5291_s2 + $0x38] sm:$0xf] }
 0x138   :  { %4021 = vtanh.f32 %v604_v45 }
 0x140   :  { %v4020_v53 = vpop.eup %4019 }
 0x141   :  { %v609_v63 = vmul.f32 %v4020_v53, %v607_v52 }
 0x142   :  { %v4022_v0 = vpop.eup %4021 }
 0x143   :  { %v613_v1 = vadd.f32 %v611_v56, %v609_v63  ;;  %v610_v3 = vmul.f32 %v4022_v0, %v608_v59  ;;  %v4576_v59 = vld [vmem:[%s5291_s2 + $0x24] sm:$0xf] }
 0x145   :  { %615 = vst [vmem:[#allocation5] sm:$0xff] %v613_v1  ;;  %v614_v5 = vadd.f32 %v612_v58, %v610_v3  ;;  %v4590_v3 = vld [vmem:[%s5291_s2 + $0x2c] sm:$0xf] }
 0x147   :  { %616 = vst [vmem:[#allocation5 + $0x8] sm:$0xff] %v614_v5  ;;  %v684_v6 = vpack.c.bf16 %v614_v5, %v613_v1  ;;  %v3513_v17 = vpack.c.bf16 %v614_v5, %v614_v5 }
 0x149   :  { %v693_v7 = vrot.slane %v684_v6, %v4448_v4  ;;  %v700_v20 = vrot.slane %v3513_v17, %v4448_v4 }
 0x14b   :  { %v709_v8 = vrot.slane %v693_v7, %v4448_v4  ;;  %v701_v9 = vcombine.high %v693_v7, %v693_v7  ;;  %v4495_v25 = vrot.slane %v700_v20, %v4448_v4  ;;  %v702_v28 = vcombine.high %v700_v20, %v700_v20 }
 0x14d   :  { %v3514_v48 = vpack.i.b16 %v709_v8, %v709_v8  ;;  %v4452_v10 = vcombine.high %v709_v8, %v709_v8  ;;  %v723_v11 = vrot.slane %v701_v9, %v4448_v4  ;;  %v736_v13 = vunpack.i.h.s16 %v709_v8  ;;  %v4600_v8 = vld [vmem:[%s5291_s2 + $0x34] sm:$0xf] }
 0x14e   :  { %v3518_v27 = vpack.i.b16 %v4495_v25, %v4495_v25  ;;  %v730_v34 = vrot.slane %v702_v28, %v4448_v4  ;;  %v732_v42 = vcombine.high %v4495_v25, %v4495_v25  ;;  %v744_v63 = vunpack.i.h.s16 %v4495_v25 }
 0x14f   :  { %v755_v49 = vrot.slane %v3514_v48, %v4433_v62  ;;  %v3516_v12 = vpack.i.b16 %v4452_v10, %v4452_v10  ;;  %v4469_v16 = vcombine.high %v723_v11, %v723_v11  ;;  %v797_v18 = vpack.i.b16 %v736_v13, %v736_v13 }
 0x150   :  { %v3515_v26 = vpack.i.b16 %v723_v11, %v723_v11  ;;  %v738_v31 = vunpack.i.h.s16 %v723_v11  ;;  %v1123_v32 = vrot.slane %v3518_v27, %v4433_v62  ;;  %v3519_v36 = vpack.i.b16 %v730_v34, %v730_v34  ;;  %v4610_v11 = vld [vmem:[%s5291_s2 + $0x3c] sm:$0xf] }
 0x151   :  { %3711 = vmatmul.mubr.bf16.vlgmr.msra.gmra.mrb[8].mxu1 %v755_v49  ;;  %v939_v14 = vrot.slane %v3516_v12, %v4433_v62  ;;  %v3517_v19 = vpack.i.b16 %v4469_v16, %v4469_v16  ;;  %v801_v21 = vrot.slane %v797_v18, %v4433_v62  ;;  %v740_v39 = vunpack.i.h.s16 %v4452_v10 }
 0x152   :  { %3715 = vmatpush3.bf16.xpose.msra.mxu1 %v4459_v61  ;;  %3716 = vmatprep.mubr.msk.bf16.mxu1 %vm4149_vm0, %v5300_v2  ;;  %v847_v29 = vrot.slane %v3515_v26, %v4433_v62  ;;  %v889_v35 = vpack.i.b16 %v738_v31, %v738_v31  ;;  %v1215_v40 = vrot.slane %v3519_v36, %v4433_v62  ;;  %v742_v47 = vunpack.i.h.s16 %v4469_v16 }
 0x153   :  { %3735 = vmatmul.mubr.bf16.vlgmr.msra.gmra.mrb[4].mxu0 %v939_v14  ;;  %3720 = vmatprep.subr.bf16.mxu1 %v5300_v2  ;;  %v1031_v23 = vrot.slane %v3517_v19, %v4433_v62  ;;  %v981_v43 = vpack.i.b16 %v740_v39, %v740_v39  ;;  %v3520_v44 = vpack.i.b16 %v732_v42, %v732_v42  ;;  %v746_v5 = vunpack.i.h.s16 %v730_v34 }
 0x154   :  { %3745 = vmatpush3.bf16.xpose.msra.mxu0 %v4467_v15  ;;  %3746 = vmatprep.mubr.msk.bf16.mxu0 %vm4149_vm0, %v5300_v2  ;;  %v893_v37 = vrot.slane %v889_v35, %v4433_v62  ;;  %v734_v52 = vcombine.high %v730_v34, %v730_v34  ;;  %v1073_v53 = vpack.i.b16 %v742_v47, %v742_v47  ;;  %v748_v9 = vunpack.i.h.s16 %v732_v42 }
 0x155   :  { %3756 = vmatprep.subr.bf16.mxu0 %v5300_v2  ;;  %v985_v45 = vrot.slane %v981_v43, %v4433_v62  ;;  %v1307_v50 = vrot.slane %v3520_v44, %v4433_v62  ;;  %v1165_v58 = vpack.i.b16 %v744_v63, %v744_v63  ;;  %v1257_v6 = vpack.i.b16 %v746_v5, %v746_v5 }
 0x156   :  { %v3521_v57 = vpack.i.b16 %v734_v52, %v734_v52  ;;  %v1077_v56 = vrot.slane %v1073_v53, %v4433_v62  ;;  %v1349_v48 = vpack.i.b16 %v748_v9, %v748_v9  ;;  %v750_v49 = vunpack.i.h.s16 %v734_v52 }
 0x157   :  { %v1169_v1 = vrot.slane %v1165_v58, %v4433_v62  ;;  %v1261_v7 = vrot.slane %v1257_v6, %v4433_v62  ;;  %v4151_v14 = vmov -1e+30   ;;  %v4668_v16 = vand.u32 127, %v76_v60 }
 0x158   :  { %v1399_v0 = vrot.slane %v3521_v57, %v4433_v62  ;;  %v1353_v10 = vrot.slane %v1349_v48, %v4433_v62  ;;  %v1441_v12 = vpack.i.b16 %v750_v49, %v750_v49  ;;  %618 = vst.msk [vmem:[#allocation2] sm:$0x1] %vm617_vm1, %v4151_v14  ;;  %619 = vst.msk [vmem:[#allocation2 + $0x1] sm:$0x1] %vm617_vm1, %v4151_v14 }
 0x159   :  { %3717 = vmatmul.mubr.bf16.vlgmr.msra.gmra.mrb[12].mxu1 %v801_v21  ;;  %620 = vst.msk [vmem:[#allocation2 + $0x2] sm:$0x1] %vm617_vm1, %v4151_v14  ;;  %621 = vst.msk [vmem:[#allocation2 + $0x3] sm:$0x1] %vm617_vm1, %v4151_v14  ;;  %vm1492_vm2 = vcmp.lt.s32.totalorder %v4668_v16, 8 }
 0x15a   :  { %3721 = vmatpush3.bf16.xpose.msra.mxu1 %v4486_v22  ;;  %3722 = vmatprep.mubr.msk.bf16.mxu1 %vm4149_vm0, %v5300_v2  ;;  %v1445_v13 = vrot.slane %v1441_v12, %v4433_v62  ;;  %622 = vst.msk [vmem:[#allocation2 + $0x4] sm:$0x1] %vm617_vm1, %v4151_v14  ;;  %623 = vst.msk [vmem:[#allocation2 + $0x5] sm:$0x1] %vm617_vm1, %v4151_v14 }
 0x15b   :  { %3747 = vmatmul.mubr.bf16.vlgmr.msra.gmra.mrb[8].mxu0 %v1031_v23  ;;  %3726 = vmatprep.subr.bf16.mxu1 %v5300_v2  ;;  %624 = vst.msk [vmem:[#allocation2 + $0x6] sm:$0x1] %vm617_vm1, %v4151_v14  ;;  %625 = vst.msk [vmem:[#allocation2 + $0x7] sm:$0x1] %vm617_vm1, %v4151_v14 }
 0x15c   :  { %3757 = vmatpush3.bf16.xpose.msra.mxu0 %v4492_v24  ;;  %3758 = vmatprep.mubr.msk.bf16.mxu0 %vm4149_vm0, %v5300_v2  ;;  %626 = vst.msk [vmem:[#allocation2 + $0x8] sm:$0x1] %vm617_vm1, %v4151_v14  ;;  %627 = vst.msk [vmem:[#allocation2 + $0x9] sm:$0x1] %vm617_vm1, %v4151_v14 }
 0x15d   :  { %3768 = vmatprep.subr.bf16.mxu0 %v5300_v2  ;;  %628 = vst.msk [vmem:[#allocation2 + $0xa] sm:$0x1] %vm617_vm1, %v4151_v14  ;;  %629 = vst.msk [vmem:[#allocation2 + $0xb] sm:$0x1] %vm617_vm1, %v4151_v14 }
 0x15e   :  { %630 = vst.msk [vmem:[#allocation2 + $0xc] sm:$0x1] %vm617_vm1, %v4151_v14  ;;  %631 = vst.msk [vmem:[#allocation2 + $0xd] sm:$0x1] %vm617_vm1, %v4151_v14 }
 0x15f   :  { %632 = vst.msk [vmem:[#allocation2 + $0xe] sm:$0x1] %vm617_vm1, %v4151_v14  ;;  %633 = vst.msk [vmem:[#allocation2 + $0xf] sm:$0x1] %vm617_vm1, %v4151_v14  ;;  %v4777_v16 = vld [vmem:[#allocation2 + $0x1] sm:$0x1] }
 0x161   :  { %3723 = vmatmul.mubr.bf16.vlgmr.msra.gmra.mrb[16].mxu1 %v847_v29 }
 0x162   :  { %3727 = vmatpush3.bf16.xpose.msra.mxu1 %v4511_v30  ;;  %3728 = vmatprep.mubr.msk.bf16.mxu1 %vm4149_vm0, %v5300_v2 }
 0x163   :  { %3759 = vmatmul.mubr.bf16.vlgmr.msra.gmra.mrb[12].mxu0 %v1123_v32  ;;  %3738 = vmatprep.subr.bf16.mxu1 %v5300_v2 }
 0x164   :  { %3769 = vmatpush3.bf16.xpose.msra.mxu0 %v4517_v33  ;;  %3770 = vmatprep.mubr.msk.bf16.mxu0 %vm4149_vm0, %v5300_v2 }
 0x165   :  { %3780 = vmatprep.subr.bf16.mxu0 %v5300_v2 }
 0x169   :  { %3729 = vmatmul.mubr.bf16.vlgmr.msra.gmra.mrb[20].mxu1 %v893_v37 }
 0x16a   :  { %3739 = vmatpush3.bf16.xpose.msra.mxu1 %v4532_v38  ;;  %3740 = vmatprep.mubr.msk.bf16.mxu1 %vm4149_vm0, %v5300_v2 }
 0x16b   :  { %3771 = vmatmul.mubr.bf16.vlgmr.msra.gmra.mrb[16].mxu0 %v1215_v40  ;;  %3750 = vmatprep.subr.bf16.mxu1 %v5300_v2 }
 0x16c   :  { %3781 = vmatpush3.bf16.xpose.msra.mxu0 %v4539_v41  ;;  %3782 = vmatprep.mubr.msk.bf16.mxu0 %vm4149_vm0, %v5300_v2 }
 0x16d   :  { %3792 = vmatprep.subr.bf16.mxu0 %v5300_v2 }
 0x171   :  { %3741 = vmatmul.mubr.bf16.vlgmr.msra.gmra.mrb[24].mxu1 %v985_v45 }
 0x172   :  { %3751 = vmatpush3.bf16.xpose.msra.mxu1 %v4555_v46  ;;  %3752 = vmatprep.mubr.msk.bf16.mxu1 %vm4149_vm0, %v5300_v2 }
 0x173   :  { %3783 = vmatmul.mubr.bf16.vlgmr.msra.gmra.mrb[20].mxu0 %v1307_v50  ;;  %3762 = vmatprep.subr.bf16.mxu1 %v5300_v2 }
 0x174   :  { %3793 = vmatpush3.bf16.xpose.msra.mxu0 %v4562_v51  ;;  %3794 = vmatprep.mubr.msk.bf16.mxu0 %vm4149_vm0, %v5300_v2 }
 0x175   :  { %3804 = vmatprep.subr.bf16.mxu0 %v5300_v2 }
 0x179   :  { %3753 = vmatmul.mubr.bf16.vlgmr.msra.gmra.mrb[28].mxu1 %v1077_v56 }
 0x17a   :  { %3763 = vmatpush3.bf16.xpose.msra.mxu1 %v4576_v59  ;;  %3764 = vmatprep.mubr.msk.bf16.mxu1 %vm4149_vm0, %v5300_v2 }
 0x17b   :  { %3795 = vmatmul.mubr.bf16.vlgmr.msra.gmra.mrb[24].mxu0 %v1399_v0  ;;  %3774 = vmatprep.subr.bf16.mxu1 %v5300_v2 }
 0x17c   :  { %3806 = vmatprep.mubr.msk.bf16.mxu0 %vm4149_vm0, %v5300_v2 }
 0x181   :  { %3765 = vmatmul.mubr.bf16.vlgmr.msra.gmra.mrb[32].mxu1 %v1169_v1 }
 0x182   :  { %3775 = vmatpush3.bf16.xpose.msra.mxu1 %v4590_v3  ;;  %3776 = vmatprep.mubr.msk.bf16.mxu1 %vm4149_vm0, %v5300_v2 }
 0x183   :  { %3786 = vmatprep.subr.bf16.mxu1 %v5300_v2 }
 0x189   :  { %3777 = vmatmul.mubr.bf16.vlgmr.msra.gmra.mrb[36].mxu1 %v1261_v7 }
 0x18a   :  { %3787 = vmatpush3.bf16.xpose.msra.mxu1 %v4600_v8  ;;  %3788 = vmatprep.mubr.msk.bf16.mxu1 %vm4149_vm0, %v5300_v2 }
 0x18b   :  { %3798 = vmatprep.subr.bf16.mxu1 %v5300_v2 }
 0x191   :  { %3789 = vmatmul.mubr.bf16.vlgmr.msra.gmra.mrb[40].mxu1 %v1353_v10 }
 0x192   :  { %3799 = vmatpush3.bf16.xpose.msra.mxu1 %v4610_v11  ;;  %3800 = vmatprep.mubr.msk.bf16.mxu1 %vm4149_vm0, %v5300_v2 }
 0x193   :  { %3810 = vmatprep.subr.bf16.mxu1 %v5300_v2 }
 0x199   :  { %3801 = vmatmul.mubr.bf16.vlgmr.msra.gmra.mrb[44].mxu1 %v1445_v13 }
 0x19a   :  { %3812 = vmatprep.mubr.msk.bf16.mxu1 %vm4149_vm0, %v5300_v2 }
 0x224   :  { %v791_v17 = vpop.f32.mrb[8].mxu1 }
 0x225   :  { %v4673_v18 = vsel %vm1492_vm2, %v791_v17, -1e+30  ;;  %v3712_v19 = vpop.f32.mrb[9].mxu1 }
 0x226   :  { %v794_v20 = vpop.f32.mrb[10].mxu1  ;;  %v975_v21 = vpop.f32.mrb[4].mxu0  ;;  %v1526_v23 = vsel %vm1525_vm3, %v4673_v18, -inf }
 0x227   :  { %1527 = vmax.xlane.f32.xlu0 %v1526_v23  ;;  %v3713_v25 = vpop.f32.mrb[11].mxu1  ;;  %v3736_v26 = vpop.f32.mrb[5].mxu0  ;;  %v4685_v36 = vsel %vm1492_vm2, %v975_v21, -1e+30 }
 0x228   :  { %v978_v27 = vpop.f32.mrb[6].mxu0  ;;  %v1538_v43 = vsel %vm1525_vm3, %v4685_v36, -inf }
 0x229   :  { %v3737_v60 = vpop.f32.mrb[7].mxu0 }
 0x22c   :  { %v837_v28 = vpop.f32.mrb[12].mxu1 }
 0x22d   :  { %v4679_v29 = vsel %vm1492_vm2, %v837_v28, -1e+30  ;;  %v3718_v31 = vpop.f32.mrb[13].mxu1 }
 0x22e   :  { %v840_v32 = vpop.f32.mrb[14].mxu1  ;;  %v1067_v34 = vpop.f32.mrb[8].mxu0  ;;  %v1529_v35 = vsel %vm1525_vm3, %v4679_v29, -inf }
 0x22f   :  { %1530 = vmax.xlane.f32.xlu0 %v1529_v35  ;;  %v3719_v37 = vpop.f32.mrb[15].mxu1  ;;  %v3748_v39 = vpop.f32.mrb[9].mxu0  ;;  %v4691_v44 = vsel %vm1492_vm2, %v1067_v34, -1e+30 }
 0x230   :  { %v1070_v40 = vpop.f32.mrb[10].mxu0  ;;  %v1544_v56 = vsel %vm1525_vm3, %v4691_v44, -inf }
 0x231   :  { %v3749_v42 = vpop.f32.mrb[11].mxu0 }
 0x233   :  { %1539 = vmax.xlane.f32.xlu0 %v1538_v43 }
 0x234   :  { %v883_v45 = vpop.f32.mrb[16].mxu1 }
 0x235   :  { %v4695_v47 = vsel %vm1492_vm2, %v883_v45, -1e+30  ;;  %v3724_v50 = vpop.f32.mrb[17].mxu1 }
 0x236   :  { %v886_v52 = vpop.f32.mrb[18].mxu1  ;;  %v1159_v53 = vpop.f32.mrb[12].mxu0  ;;  %v1532_v57 = vsel %vm1525_vm3, %v4695_v47, -inf }
 0x237   :  { %v4703_v63 = vsel %vm1492_vm2, %v1159_v53, -1e+30  ;;  %1533 = vmax.xlane.f32.xlu1 %v1532_v57  ;;  %v3725_v0 = vpop.f32.mrb[19].mxu1  ;;  %1545 = vmax.xlane.f32.xlu0 %v1544_v56  ;;  %v3760_v58 = vpop.f32.mrb[13].mxu0 }
 0x238   :  { %v1162_v1 = vpop.f32.mrb[14].mxu0  ;;  %v1550_v6 = vsel %vm1525_vm3, %v4703_v63, -inf }
 0x239   :  { %v3761_v5 = vpop.f32.mrb[15].mxu0 }
 0x23b   :  { %1551 = vmax.xlane.f32.xlu0 %v1550_v6 }
 0x23c   :  { %v929_v7 = vpop.f32.mrb[20].mxu1 }
 0x23d   :  { %v4709_v9 = vsel %vm1492_vm2, %v929_v7, -1e+30  ;;  %v3730_v48 = vpop.f32.mrb[21].mxu1 }
 0x23e   :  { %v932_v10 = vpop.f32.mrb[22].mxu1  ;;  %v1251_v49 = vpop.f32.mrb[16].mxu0  ;;  %v1535_v12 = vsel %vm1525_vm3, %v4709_v9, -inf }
 0x23f   :  { %v4715_v13 = vsel %vm1492_vm2, %v1251_v49, -1e+30  ;;  %1536 = vmax.xlane.f32.xlu1 %v1535_v12  ;;  %v3731_v14 = vpop.f32.mrb[23].mxu1  ;;  %v3772_v17 = vpop.f32.mrb[17].mxu0 }
 0x240   :  { %v1254_v19 = vpop.f32.mrb[18].mxu0  ;;  %v1556_v20 = vsel %vm1525_vm3, %v4715_v13, -inf }
 0x241   :  { %1557 = vmax.xlane.f32.xlu0 %v1556_v20  ;;  %v3773_v21 = vpop.f32.mrb[19].mxu0 }
 0x244   :  { %v1021_v23 = vpop.f32.mrb[24].mxu1 }
 0x245   :  { %v4721_v25 = vsel %vm1492_vm2, %v1021_v23, -1e+30  ;;  %v3742_v26 = vpop.f32.mrb[25].mxu1 }
 0x246   :  { %v1024_v27 = vpop.f32.mrb[26].mxu1  ;;  %v1343_v60 = vpop.f32.mrb[20].mxu0  ;;  %v1541_v28 = vsel %vm1525_vm3, %v4721_v25, -inf }
 0x247   :  { %v4727_v31 = vsel %vm1492_vm2, %v1343_v60, -1e+30  ;;  %1542 = vmax.xlane.f32.xlu1 %v1541_v28  ;;  %v3743_v32 = vpop.f32.mrb[27].mxu1  ;;  %v3784_v34 = vpop.f32.mrb[21].mxu0 }
 0x248   :  { %v1346_v35 = vpop.f32.mrb[22].mxu0  ;;  %v1562_v37 = vsel %vm1525_vm3, %v4727_v31, -inf }
 0x249   :  { %1563 = vmax.xlane.f32.xlu0 %v1562_v37  ;;  %v3785_v39 = vpop.f32.mrb[23].mxu0 }
 0x24c   :  { %v1113_v40 = vpop.f32.mrb[28].mxu1 }
 0x24d   :  { %v4733_v42 = vsel %vm1492_vm2, %v1113_v40, -1e+30  ;;  %v3754_v43 = vpop.f32.mrb[29].mxu1 }
 0x24e   :  { %v1116_v45 = vpop.f32.mrb[30].mxu1  ;;  %v1435_v50 = vpop.f32.mrb[24].mxu0  ;;  %v1547_v52 = vsel %vm1525_vm3, %v4733_v42, -inf }
 0x24f   :  { %v4739_v53 = vsel %vm1492_vm2, %v1435_v50, -1e+30  ;;  %v3796_v57 = vpop.f32.mrb[25].mxu0  ;;  %1548 = vmax.xlane.f32.xlu1 %v1547_v52  ;;  %v3755_v56 = vpop.f32.mrb[31].mxu1  ;;  %v4767_v45 = vld [vmem:[#allocation2] sm:$0x1] }
 0x250   :  { %v1438_v0 = vpop.f32.mrb[26].mxu0  ;;  %v1568_v58 = vsel %vm1525_vm3, %v4739_v53, -inf }
 0x251   :  { %1569 = vmax.xlane.f32.xlu0 %v1568_v58  ;;  %v3797_v1 = vpop.f32.mrb[27].mxu0  ;;  %v4782_v58 = vld [vmem:[#allocation2 + $0x4] sm:$0x1] }
 0x252   :  { %v4901_v1 = vld [vmem:[#allocation2 + $0xb] sm:$0x1] }
 0x254   :  { %v1205_v5 = vpop.f32.mrb[32].mxu1 }
 0x255   :  { %v4745_v6 = vsel %vm1492_vm2, %v1205_v5, -1e+30  ;;  %v3766_v7 = vpop.f32.mrb[33].mxu1 }
 0x256   :  { %v1208_v48 = vpop.f32.mrb[34].mxu1  ;;  %v1553_v10 = vsel %vm1525_vm3, %v4745_v6, -inf }
 0x257   :  { %1554 = vmax.xlane.f32.xlu1 %v1553_v10  ;;  %v3767_v49 = vpop.f32.mrb[35].mxu1  ;;  %v4792_v48 = vld [vmem:[#allocation2 + $0x2] sm:$0x1]  ;;  %v4794_v10 = vld [vmem:[#allocation2 + $0x6] sm:$0x1] }
 0x25c   :  { %v1297_v12 = vpop.f32.mrb[36].mxu1 }
 0x25d   :  { %v4751_v14 = vsel %vm1492_vm2, %v1297_v12, -1e+30  ;;  %v3778_v17 = vpop.f32.mrb[37].mxu1 }
 0x25e   :  { %v1300_v19 = vpop.f32.mrb[38].mxu1  ;;  %v1559_v20 = vsel %vm1525_vm3, %v4751_v14, -inf }
 0x25f   :  { %1560 = vmax.xlane.f32.xlu1 %v1559_v20  ;;  %v3779_v21 = vpop.f32.mrb[39].mxu1 }
 0x260   :  { %v4806_v21 = vld [vmem:[#allocation2 + $0x8] sm:$0x1] }
 0x261   :  { %5317 = vst [vmem:[#allocation9_spill] sm:$0xff] %v4806_v21 }
 0x264   :  { %v1389_v23 = vpop.f32.mrb[40].mxu1 }
 0x265   :  { %v4757_v26 = vsel %vm1492_vm2, %v1389_v23, -1e+30  ;;  %v3790_v27 = vpop.f32.mrb[41].mxu1 }
 0x266   :  { %v1392_v60 = vpop.f32.mrb[42].mxu1  ;;  %v1565_v28 = vsel %vm1525_vm3, %v4757_v26, -inf  ;;  %v4872_v27 = vld [vmem:[#allocation2 + $0xe] sm:$0x1] }
 0x267   :  { %1566 = vmax.xlane.f32.xlu1 %v1565_v28  ;;  %v3791_v32 = vpop.f32.mrb[43].mxu1  ;;  %5323 = vst [vmem:[#allocation15_spill] sm:$0xff] %v4872_v27 }
 0x268   :  { %v4820_v32 = vld [vmem:[#allocation2 + $0x3] sm:$0x1] }
 0x26c   :  { %v1481_v34 = vpop.f32.mrb[44].mxu1 }
 0x26d   :  { %v4763_v35 = vsel %vm1492_vm2, %v1481_v34, -1e+30  ;;  %v3802_v37 = vpop.f32.mrb[45].mxu1 }
 0x26e   :  { %v1484_v39 = vpop.f32.mrb[46].mxu1  ;;  %v1571_v40 = vsel %vm1525_vm3, %v4763_v35, -inf }
 0x26f   :  { %1572 = vmax.xlane.f32.xlu1 %v1571_v40  ;;  %v3803_v43 = vpop.f32.mrb[47].mxu1  ;;  %v4826_v39 = vld [vmem:[#allocation2 + $0xa] sm:$0x1]  ;;  %v2141_v40 = vsel %vm2139_vm4, %v4418_v54, 0 }
 0x270   :  { %5319 = vst [vmem:[#allocation11_spill] sm:$0xff] %v4826_v39  ;;  %3805 = vmatpush3.bf16.msra.mxu0 %v2141_v40 }
 0x271   :  { %3816 = vmatprep.subr.bf16.mxu0 %v5300_v2 }
 0x2b4   :  { %v1528_v50 = vpop.xlane.xlu0 %1527 }
 0x2b5   :  { %v4770_v52 = vmax.f32 %v4767_v45, %v1528_v50 }
 0x2b7   :  { %2905 = vst.msk [vmem:[#allocation2] sm:$0x1] %vm617_vm1, %v4770_v52  ;;  %1640 = vperm.xlu0 %3920, %v4770_v52  }
 0x2bc   :  { %v1531_v56 = vpop.xlane.xlu0 %1530 }
 0x2bd   :  { %v4780_v0 = vmax.f32 %v4777_v16, %v1531_v56 }
 0x2bf   :  { %2906 = vst.msk [vmem:[#allocation2 + $0x1] sm:$0x1] %vm617_vm1, %v4780_v0  ;;  %1649 = vperm.xlu1 %3921, %v4780_v0  }
 0x2c0   :  { %v1540_v5 = vpop.xlane.xlu0 %1539 }
 0x2c1   :  { %v4790_v7 = vmax.f32 %v4782_v58, %v1540_v5 }
 0x2c3   :  { %2909 = vst.msk [vmem:[#allocation2 + $0x4] sm:$0x1] %vm617_vm1, %v4790_v7 }
 0x2c4   :  { %v1534_v12 = vpop.xlane.xlu1 %1533  ;;  %v1546_v17 = vpop.xlane.xlu0 %1545 }
 0x2c5   :  { %v4801_v19 = vmax.f32 %v4792_v48, %v1534_v12  ;;  %v4804_v20 = vmax.f32 %v4794_v10, %v1546_v17  ;;  %v4846_v12 = vld [vmem:[#allocation2 + $0x5] sm:$0x1] }
 0x2c7   :  { %2907 = vst.msk [vmem:[#allocation2 + $0x2] sm:$0x1] %vm617_vm1, %v4801_v19  ;;  %2911 = vst.msk [vmem:[#allocation2 + $0x6] sm:$0x1] %vm617_vm1, %v4804_v20  ;;  %1658 = vperm.xlu1 %3921, %v4801_v19  }
 0x2c8   :  { %v1552_v60 = vpop.xlane.xlu0 %1551 }
 0x2c9   :  { %v4818_v28 = vmax.f32 %v4806_v21, %v1552_v60  ;;  %v4849_v60 = vld [vmem:[#allocation2 + $0xc] sm:$0x1] }
 0x2ca   :  { %5321 = vst [vmem:[#allocation13_spill] sm:$0xff] %v4849_v60 }
 0x2cb   :  { %5318 = vst [vmem:[#allocation10_spill] sm:$0xff] %v4818_v28  ;;  %2913 = vst.msk [vmem:[#allocation2 + $0x8] sm:$0x1] %vm617_vm1, %v4818_v28 }
 0x2cc   :  { %v1537_v37 = vpop.xlane.xlu1 %1536 }
 0x2cd   :  { %v4831_v43 = vmax.f32 %v4820_v32, %v1537_v37  ;;  %v2187_v37 = vsel %vm2139_vm4, %v4459_v61, 0 }
 0x2ce   :  { %v1558_v50 = vpop.xlane.xlu0 %1557  ;;  %3811 = vmatpush3.bf16.msra.mxu1 %v2187_v37 }
 0x2cf   :  { %2908 = vst.msk [vmem:[#allocation2 + $0x3] sm:$0x1] %vm617_vm1, %v4831_v43  ;;  %v4839_v5 = vmax.f32 %v4826_v39, %v1558_v50  ;;  %1667 = vperm.xlu1 %3921, %v4831_v43   ;;  %3822 = vmatprep.subr.bf16.mxu1 %v5300_v2 }
 0x2d1   :  { %5320 = vst [vmem:[#allocation12_spill] sm:$0xff] %v4839_v5  ;;  %2915 = vst.msk [vmem:[#allocation2 + $0xa] sm:$0x1] %vm617_vm1, %v4839_v5 }
 0x2d3   :  { %1676 = vperm.xlu1 %3921, %v4790_v7  }
 0x2d4   :  { %v1543_v17 = vpop.xlane.xlu1 %1542 }
 0x2d5   :  { %v4854_v40 = vmax.f32 %v4846_v12, %v1543_v17  ;;  %v4869_v17 = vld [vmem:[#allocation2 + $0x7] sm:$0x1] }
 0x2d6   :  { %v1564_v50 = vpop.xlane.xlu0 %1563 }
 0x2d7   :  { %2910 = vst.msk [vmem:[#allocation2 + $0x5] sm:$0x1] %vm617_vm1, %v4854_v40  ;;  %v4862_v34 = vmax.f32 %v4849_v60, %v1564_v50  ;;  %1685 = vperm.xlu1 %3921, %v4854_v40  }
 0x2d9   :  { %5322 = vst [vmem:[#allocation14_spill] sm:$0xff] %v4862_v34  ;;  %2917 = vst.msk [vmem:[#allocation2 + $0xc] sm:$0x1] %vm617_vm1, %v4862_v34 }
 0x2db   :  { %1694 = vperm.xlu1 %3921, %v4804_v20  }
 0x2dc   :  { %v1549_v37 = vpop.xlane.xlu1 %1548 }
 0x2dd   :  { %v4875_v49 = vmax.f32 %v4869_v17, %v1549_v37  ;;  %v4889_v37 = vld [vmem:[#allocation2 + $0x9] sm:$0x1] }
 0x2de   :  { %v1570_v50 = vpop.xlane.xlu0 %1569 }
 0x2df   :  { %2912 = vst.msk [vmem:[#allocation2 + $0x7] sm:$0x1] %vm617_vm1, %v4875_v49  ;;  %v4882_v61 = vmax.f32 %v4872_v27, %v1570_v50  ;;  %1703 = vperm.xlu1 %3921, %v4875_v49   ;;  %v4913_v50 = vld [vmem:[#allocation2 + $0xd] sm:$0x1] }
 0x2e0   :  { %5325 = vst [vmem:[#allocation17_spill] sm:$0xff] %v4913_v50 }
 0x2e1   :  { %5324 = vst [vmem:[#allocation16_spill] sm:$0xff] %v4882_v61  ;;  %2919 = vst.msk [vmem:[#allocation2 + $0xe] sm:$0x1] %vm617_vm1, %v4882_v61 }
 0x2e3   :  { %1712 = vperm.xlu1 %3921, %v4818_v28  }
 0x2e4   :  { %v1555_v54 = vpop.xlane.xlu1 %1554 }
 0x2e5   :  { %v4893_v23 = vmax.f32 %v4889_v37, %v1555_v54  ;;  %v4923_v54 = vld [vmem:[#allocation2 + $0xf] sm:$0x1] }
 0x2e6   :  { %5327 = vst [vmem:[#allocation19_spill] sm:$0xff] %v4923_v54 }
 0x2e7   :  { %2914 = vst.msk [vmem:[#allocation2 + $0x9] sm:$0x1] %vm617_vm1, %v4893_v23  ;;  %1721 = vperm.xlu0 %3920, %v4893_v23   ;;  %1730 = vperm.xlu1 %3921, %v4839_v5  }
 0x2eb   :  { %1748 = vperm.xlu1 %3921, %v4862_v34  }
 0x2ec   :  { %v1561_v56 = vpop.xlane.xlu1 %1560 }
 0x2ed   :  { %v4905_v57 = vmax.f32 %v4901_v1, %v1561_v56 }
 0x2ef   :  { %2916 = vst.msk [vmem:[#allocation2 + $0xb] sm:$0x1] %vm617_vm1, %v4905_v57  ;;  %1739 = vperm.xlu0 %3920, %v4905_v57   ;;  %1766 = vperm.xlu1 %3921, %v4882_v61  }
 0x2f4   :  { %v1567_v2 = vpop.xlane.xlu1 %1566 }
 0x2f5   :  { %v4916_v4 = vmax.f32 %v4913_v50, %v1567_v2 }
 0x2f7   :  { %5326 = vst [vmem:[#allocation18_spill] sm:$0xff] %v4916_v4  ;;  %2918 = vst.msk [vmem:[#allocation2 + $0xd] sm:$0x1] %vm617_vm1, %v4916_v4  ;;  %1757 = vperm.xlu0 %3920, %v4916_v4  }
 0x2fc   :  { %v1573_v27 = vpop.xlane.xlu1 %1572 }
 0x2fd   :  { %v4926_v34 = vmax.f32 %v4923_v54, %v1573_v27 }
 0x2ff   :  { %5328 = vst [vmem:[#allocation20_spill] sm:$0xff] %v4926_v34  ;;  %2920 = vst.msk [vmem:[#allocation2 + $0xf] sm:$0x1] %vm617_vm1, %v4926_v34  ;;  %1775 = vperm.xlu0 %3920, %v4926_v34  }
 0x336   :  { %v1641_v2 = vpop.permute.xlu0 %1640 }
 0x337   :  { %v1646_v56 = vrot.slane %v1641_v2, %v4433_v62 }
 0x339   :  { %v1782_v60 = vsub.f32 %v4673_v18, %v1646_v56  ;;  %v2233_v18 = vsel %vm2139_vm4, %v4486_v22, 0 }
 0x33b   :  { %v1798_v5 = vmul.f32 1.442695, %v1782_v60 }
 0x33d   :  { %4023 = vpow2.f32 %v1798_v5 }
 0x33e   :  { %v1650_v39 = vpop.permute.xlu1 %1649 }
 0x33f   :  { %v1655_v28 = vrot.slane %v1650_v39, %v4433_v62 }
 0x341   :  { %v1783_v27 = vsub.f32 %v4679_v29, %v1655_v28  ;;  %v5329_v29 = vmov 0.0  }
 0x343   :  { %v1800_v21 = vmul.f32 1.442695, %v1783_v27 }
 0x345   :  { %4025 = vpow2.f32 %v1800_v21 }
 0x346   :  { %v1659_v61 = vpop.permute.xlu1 %1658 }
 0x347   :  { %v4024_v54 = vpop.eup %4023  ;;  %v1664_v4 = vrot.slane %v1659_v61, %v4433_v62 }
 0x348   :  { %v1862_v34 = vsel %vm1525_vm3, %v4024_v54, 0.0  ;;  %v2119_v50 = vpack.c.bf16 %v4024_v54, %v4024_v54 }
 0x349   :  { %v1784_v5 = vsub.f32 %v4695_v47, %v1664_v4  ;;  %1863 = vadd.xlane.f32.xlu1 %v1862_v34  ;;  %v2279_v4 = vsel %vm2139_vm4, %v4511_v30, 0 }
 0x34a   :  { %3807 = vmatmul.mubr.msk.bf16.vlgmr.msra.gmra.mrb[28].mxu0 %vm2135_vm5, %v2119_v50 }
 0x34b   :  { %v1802_v39 = vmul.f32 1.442695, %v1784_v5  ;;  %3817 = vmatpush3.bf16.msra.mxu0 %v2233_v18  ;;  %3818 = vmatprep.mubr.msk.bf16.mxu0 %vm4149_vm0, %v5329_v29  ;;  %v2325_v18 = vsel %vm2139_vm4, %v4423_v55, 0 }
 0x34c   :  { %3828 = vmatprep.subr.bf16.mxu0 %v5329_v29 }
 0x34d   :  { %4027 = vpow2.f32 %v1802_v39 }
 0x34e   :  { %v1668_v21 = vpop.permute.xlu1 %1667 }
 0x34f   :  { %v4946_v28 = vpop.eup %4025  ;;  %v1673_v60 = vrot.slane %v1668_v21, %v4433_v62 }
 0x350   :  { %v2120_v22 = vpack.c.bf16 %v4946_v28, %v4946_v28 }
 0x351   :  { %v1785_v47 = vsub.f32 %v4709_v9, %v1673_v60 }
 0x352   :  { %3813 = vmatmul.mubr.msk.bf16.vlgmr.msra.gmra.mrb[48].mxu1 %vm2135_vm5, %v2120_v22  ;;  %v1677_v34 = vpop.permute.xlu1 %1676 }
 0x353   :  { %v1804_v61 = vmul.f32 1.442695, %v1785_v47  ;;  %v1682_v50 = vrot.slane %v1677_v34, %v4433_v62  ;;  %3823 = vmatpush3.bf16.msra.mxu1 %v2279_v4  ;;  %3824 = vmatprep.mubr.msk.bf16.mxu1 %vm4149_vm0, %v5329_v29 }
 0x354   :  { %3834 = vmatprep.subr.bf16.mxu1 %v5329_v29 }
 0x355   :  { %4029 = vpow2.f32 %v1804_v61  ;;  %v1786_v54 = vsub.f32 %v4685_v36, %v1682_v50  ;;  %v2371_v61 = vsel %vm2139_vm4, %v4532_v38, 0  ;;  %v2417_v38 = vsel %vm2139_vm4, %v4467_v15, 0 }
 0x356   :  { %v1686_v56 = vpop.permute.xlu1 %1685  ;;  %v1865_v15 = vsel %vm1525_vm3, %v4946_v28, 0.0 }
 0x357   :  { %v4960_v2 = vpop.eup %4027  ;;  %v1806_v30 = vmul.f32 1.442695, %v1786_v54  ;;  %v1691_v9 = vrot.slane %v1686_v56, %v4433_v62 }
 0x358   :  { %v2121_v27 = vpack.c.bf16 %v4960_v2, %v4960_v2 }
 0x359   :  { %4031 = vpow2.f32 %v1806_v30  ;;  %v1787_v5 = vsub.f32 %v4721_v25, %v1691_v9 }
 0x35a   :  { %3819 = vmatmul.mubr.msk.bf16.vlgmr.msra.gmra.mrb[32].mxu0 %vm2135_vm5, %v2121_v27  ;;  %v1695_v39 = vpop.permute.xlu1 %1694 }
 0x35b   :  { %v1808_v21 = vmul.f32 1.442695, %v1787_v5  ;;  %v1700_v36 = vrot.slane %v1695_v39, %v4433_v62  ;;  %3829 = vmatpush3.bf16.msra.mxu0 %v2325_v18  ;;  %3830 = vmatprep.mubr.msk.bf16.mxu0 %vm4149_vm0, %v5329_v29 }
 0x35c   :  { %3840 = vmatprep.subr.bf16.mxu0 %v5329_v29 }
 0x35d   :  { %4033 = vpow2.f32 %v1808_v21  ;;  %v1788_v60 = vsub.f32 %v4691_v44, %v1700_v36 }
 0x35e   :  { %v1704_v22 = vpop.permute.xlu1 %1703 }
 0x35f   :  { %v4030_v55 = vpop.eup %4029  ;;  %v1810_v4 = vmul.f32 1.442695, %v1788_v60  ;;  %v1709_v25 = vrot.slane %v1704_v22, %v4433_v62 }
 0x360   :  { %v1871_v47 = vsel %vm1525_vm3, %v4030_v55, 0.0  ;;  %v2122_v34 = vpack.c.bf16 %v4030_v55, %v4030_v55  ;;  %v2463_v55 = vsel %vm2139_vm4, %v4555_v46, 0 }
 0x361   :  { %4035 = vpow2.f32 %v1810_v4  ;;  %v1789_v50 = vsub.f32 %v4733_v42, %v1709_v25  ;;  %1872 = vadd.xlane.f32.xlu1 %v1871_v47 }
 0x362   :  { %3825 = vmatmul.mubr.msk.bf16.vlgmr.msra.gmra.mrb[52].mxu1 %vm2135_vm5, %v2122_v34  ;;  %v1713_v54 = vpop.permute.xlu1 %1712 }
 0x363   :  { %v4032_v56 = vpop.eup %4031  ;;  %v1812_v44 = vmul.f32 1.442695, %v1789_v50  ;;  %v1718_v30 = vrot.slane %v1713_v54, %v4433_v62  ;;  %3835 = vmatpush3.bf16.msra.mxu1 %v2371_v61  ;;  %3836 = vmatprep.mubr.msk.bf16.mxu1 %vm4149_vm0, %v5329_v29 }
 0x364   :  { %v1874_v9 = vsel %vm1525_vm3, %v4032_v56, 0.0  ;;  %v2123_v27 = vpack.c.bf16 %v4032_v56, %v4032_v56  ;;  %3846 = vmatprep.subr.bf16.mxu1 %v5329_v29 }
 0x365   :  { %4037 = vpow2.f32 %v1812_v44  ;;  %v1790_v42 = vsub.f32 %v4703_v63, %v1718_v30  ;;  %1875 = vadd.xlane.f32.xlu0 %v1874_v9 }
 0x366   :  { %v1722_v18 = vpop.permute.xlu0 %1721  ;;  %3831 = vmatmul.mubr.msk.bf16.vlgmr.msra.gmra.mrb[36].mxu0 %vm2135_vm5, %v2123_v27  ;;  %v1731_v5 = vpop.permute.xlu1 %1730 }
 0x367   :  { %v4034_v39 = vpop.eup %4033  ;;  %v1814_v21 = vmul.f32 1.442695, %v1790_v42  ;;  %v1727_v36 = vrot.slane %v1722_v18, %v4433_v62  ;;  %v1736_v60 = vrot.slane %v1731_v5, %v4433_v62  ;;  %3841 = vmatpush3.bf16.msra.mxu0 %v2417_v38  ;;  %3842 = vmatprep.mubr.msk.bf16.mxu0 %vm4149_vm0, %v5329_v29  ;;  %v2555_v18 = vsel %vm2139_vm4, %v4576_v59, 0 }
 0x368   :  { %v1877_v63 = vsel %vm1525_vm3, %v4034_v39, 0.0  ;;  %v2124_v22 = vpack.c.bf16 %v4034_v39, %v4034_v39  ;;  %3852 = vmatprep.subr.bf16.mxu0 %v5329_v29 }
 0x369   :  { %4039 = vpow2.f32 %v1814_v21  ;;  %v1791_v4 = vsub.f32 %v4745_v6, %v1727_v36  ;;  %v1792_v25 = vsub.f32 %v4715_v13, %v1736_v60  ;;  %1866 = vadd.xlane.f32.xlu0 %v1865_v15  ;;  %1878 = vadd.xlane.f32.xlu1 %v1877_v63  ;;  %v2509_v13 = vsel %vm2139_vm4, %v4492_v24, 0 }
 0x36a   :  { %3837 = vmatmul.mubr.msk.bf16.vlgmr.msra.gmra.mrb[56].mxu1 %vm2135_vm5, %v2124_v22  ;;  %v1749_v47 = vpop.permute.xlu1 %1748  ;;  %v1868_v24 = vsel %vm1525_vm3, %v4960_v2, 0.0  ;;  %v2601_v15 = vsel %vm2139_vm4, %v4517_v33, 0  ;;  %v2647_v33 = vsel %vm2139_vm4, %v4590_v3, 0  ;;  %v2693_v3 = vsel %vm2139_vm4, %v4539_v41, 0 }
 0x36b   :  { %v4036_v34 = vpop.eup %4035  ;;  %v1816_v28 = vmul.f32 1.442695, %v1791_v4  ;;  %v1818_v61 = vmul.f32 1.442695, %v1792_v25  ;;  %v1754_v50 = vrot.slane %v1749_v47, %v4433_v62  ;;  %3847 = vmatpush3.bf16.msra.mxu1 %v2463_v55  ;;  %3848 = vmatprep.mubr.msk.bf16.mxu1 %vm4149_vm0, %v5329_v29  ;;  %v2739_v41 = vsel %vm2139_vm4, %v4600_v8, 0 }
 0x36c   :  { %v1880_v46 = vsel %vm1525_vm3, %v4036_v34, 0.0  ;;  %v2125_v54 = vpack.c.bf16 %v4036_v34, %v4036_v34  ;;  %3858 = vmatprep.subr.bf16.mxu1 %v5329_v29 }
 0x36d   :  { %4041 = vpow2.f32 %v1816_v28  ;;  %v1794_v6 = vsub.f32 %v4727_v31, %v1754_v50  ;;  %1881 = vadd.xlane.f32.xlu0 %v1880_v46 }
 0x36e   :  { %4043 = vpow2.f32 %v1818_v61  ;;  %v1740_v56 = vpop.permute.xlu0 %1739  ;;  %3843 = vmatmul.mubr.msk.bf16.vlgmr.msra.gmra.mrb[40].mxu0 %vm2135_vm5, %v2125_v54  ;;  %v1767_v44 = vpop.permute.xlu1 %1766 }
 0x36f   :  { %v4038_v30 = vpop.eup %4037  ;;  %v1822_v9 = vmul.f32 1.442695, %v1794_v6  ;;  %v1745_v27 = vrot.slane %v1740_v56, %v4433_v62  ;;  %v1772_v38 = vrot.slane %v1767_v44, %v4433_v62  ;;  %3853 = vmatpush3.bf16.msra.mxu0 %v2509_v13  ;;  %3854 = vmatprep.mubr.msk.bf16.mxu0 %vm4149_vm0, %v5329_v29 }
 0x370   :  { %v1883_v31 = vsel %vm1525_vm3, %v4038_v30, 0.0  ;;  %v2126_v42 = vpack.c.bf16 %v4038_v30, %v4038_v30  ;;  %3864 = vmatprep.subr.bf16.mxu0 %v5329_v29 }
 0x371   :  { %4045 = vpow2.f32 %v1822_v9  ;;  %v1793_v5 = vsub.f32 %v4751_v14, %v1745_v27  ;;  %v1796_v39 = vsub.f32 %v4739_v53, %v1772_v38  ;;  %1869 = vadd.xlane.f32.xlu0 %v1868_v24  ;;  %1884 = vadd.xlane.f32.xlu1 %v1883_v31  ;;  %v2785_v38 = vsel %vm2139_vm4, %v4562_v51, 0 }
 0x372   :  { %3849 = vmatmul.mubr.msk.bf16.vlgmr.msra.gmra.mrb[60].mxu1 %vm2135_vm5, %v2126_v42  ;;  %v2831_v31 = vsel %vm2139_vm4, %v4610_v11, 0  ;;  %v5330_v42 = vsub.f32 %v4767_v45, %v4770_v52  ;;  %v5332_v52 = vsub.f32 %v4846_v12, %v4854_v40  ;;  %v5336_v12 = vsub.f32 %v4889_v37, %v4893_v23 }
 0x373   :  { %v4040_v21 = vpop.eup %4039  ;;  %v1820_v36 = vmul.f32 1.442695, %v1793_v5  ;;  %v1826_v2 = vmul.f32 1.442695, %v1796_v39  ;;  %3859 = vmatpush3.bf16.msra.mxu1 %v2555_v18  ;;  %3860 = vmatprep.mubr.msk.bf16.mxu1 %vm4149_vm0, %v5329_v29  ;;  %v5331_v5 = vsub.f32 %v4820_v32, %v4831_v43  ;;  %v5334_v32 = vsub.f32 %v4869_v17, %v4875_v49 }
 0x374   :  { %v1886_v59 = vsel %vm1525_vm3, %v4040_v21, 0.0  ;;  %v2127_v60 = vpack.c.bf16 %v4040_v21, %v4040_v21  ;;  %3870 = vmatprep.subr.bf16.mxu1 %v5329_v29  ;;  %v1606_v51 = vmul.f32 1.442695, %v5330_v42  ;;  %v1624_v40 = vmul.f32 1.442695, %v5336_v12 }
 0x375   :  { %4047 = vpow2.f32 %v1820_v36  ;;  %1887 = vadd.xlane.f32.xlu0 %v1886_v59  ;;  %v1612_v39 = vmul.f32 1.442695, %v5331_v5  ;;  %v1616_v36 = vmul.f32 1.442695, %v5332_v52  ;;  %v1620_v43 = vmul.f32 1.442695, %v5334_v32 }
 0x376   :  { %4049 = vpow2.f32 %v1826_v2  ;;  %v1758_v53 = vpop.permute.xlu0 %1757  ;;  %3855 = vmatmul.mubr.msk.bf16.vlgmr.msra.gmra.mrb[44].mxu0 %vm2135_vm5, %v2127_v60  ;;  %v5335_v60 = vsub.f32 %v4792_v48, %v4801_v19  ;;  %v5338_v49 = vsub.f32 %v4901_v1, %v4905_v57  ;;  %v5339_v19 = vsub.f32 %v4794_v10, %v4804_v20  ;;  %v5343_v57 = vld [vmem:[#allocation9_spill] sm:$0xff]  ;;  %v5344_v1 = vld [vmem:[#allocation10_spill] sm:$0xff]  ;;  %v5346_v20 = vld [vmem:[#allocation19_spill] sm:$0xff] }
 0x377   :  { %v4042_v14 = vpop.eup %4041  ;;  %v1763_v63 = vrot.slane %v1758_v53, %v4433_v62  ;;  %3865 = vmatpush3.bf16.msra.mxu0 %v2601_v15  ;;  %3866 = vmatprep.mubr.msk.bf16.mxu0 %vm4149_vm0, %v5329_v29 }
 0x378   :  { %v4044_v22 = vpop.eup %4043  ;;  %v1889_v55 = vsel %vm1525_vm3, %v4042_v14, 0.0  ;;  %v2128_v4 = vpack.c.bf16 %v4042_v14, %v4042_v14  ;;  %3876 = vmatprep.subr.bf16.mxu0 %v5329_v29  ;;  %v1610_v15 = vmul.f32 1.442695, %v5335_v60  ;;  %v1628_v17 = vmul.f32 1.442695, %v5338_v49 }
 0x379   :  { %v1795_v25 = vsub.f32 %v4757_v26, %v1763_v63  ;;  %1890 = vadd.xlane.f32.xlu1 %v1889_v55  ;;  %v1892_v47 = vsel %vm1525_vm3, %v4044_v22, 0.0  ;;  %v2129_v50 = vpack.c.bf16 %v4044_v22, %v4044_v22  ;;  %v1618_v23 = vmul.f32 1.442695, %v5339_v19  ;;  %v1831_v60 = vld [vmem:[#allocation3 + $0x1] sm:$0x1] }
 0x37a   :  { %1893 = vadd.xlane.f32.xlu0 %v1892_v47  ;;  %3861 = vmatmul.mubr.msk.bf16.vlgmr.msra.gmra.mrb[64].mxu1 %vm2135_vm5, %v2128_v4  ;;  %v5345_v55 = vsub.f32 %v5343_v57, %v5344_v1  ;;  %v1836_v49 = vld [vmem:[#allocation3 + $0x6] sm:$0x1] }
 0x37b   :  { %v4046_v34 = vpop.eup %4045  ;;  %v1824_v28 = vmul.f32 1.442695, %v1795_v25  ;;  %3871 = vmatpush3.bf16.msra.mxu1 %v2647_v33  ;;  %3872 = vmatprep.mubr.msk.bf16.mxu1 %vm4149_vm0, %v5329_v29  ;;  %v5347_v33 = vld [vmem:[#allocation20_spill] sm:$0xff] }
 0x37c   :  { %v1898_v61 = vsel %vm1525_vm3, %v4046_v34, 0.0  ;;  %3882 = vmatprep.subr.bf16.mxu1 %v5329_v29  ;;  %v2131_v27 = vpack.c.bf16 %v4046_v34, %v4046_v34  ;;  %v1622_v4 = vmul.f32 1.442695, %v5345_v55  ;;  %v5348_v25 = vsub.f32 %v5346_v20, %v5347_v33  ;;  %v1838_v55 = vld [vmem:[#allocation3 + $0x8] sm:$0x1] }
 0x37d   :  { %4051 = vpow2.f32 %v1824_v28  ;;  %v5349_v28 = vld [vmem:[#allocation11_spill] sm:$0xff] }
 0x37e   :  { %1899 = vadd.xlane.f32.xlu0 %v1898_v61  ;;  %v1776_v26 = vpop.permute.xlu0 %1775  ;;  %3867 = vmatmul.mubr.msk.bf16.vlgmr.msra.gmra.mrb[48].mxu0 %vm2135_vm5, %v2129_v50  ;;  %v1636_v47 = vmul.f32 1.442695, %v5348_v25  ;;  %v5350_v61 = vld [vmem:[#allocation12_spill] sm:$0xff] }
 0x37f   :  { %v4048_v46 = vpop.eup %4047  ;;  %v1781_v54 = vrot.slane %v1776_v26, %v4433_v62  ;;  %3877 = vmatpush3.bf16.msra.mxu0 %v2693_v3  ;;  %3878 = vmatprep.mubr.msk.bf16.mxu0 %vm4149_vm0, %v5329_v29  ;;  %v5351_v50 = vsub.f32 %v5349_v28, %v5350_v61  ;;  %v1839_v61 = vld [vmem:[#allocation3 + $0x9] sm:$0x1] }
 0x380   :  { %v4050_v13 = vpop.eup %4049  ;;  %v1895_v6 = vsel %vm1525_vm3, %v4048_v46, 0.0  ;;  %v2130_v56 = vpack.c.bf16 %v4048_v46, %v4048_v46  ;;  %3888 = vmatprep.subr.bf16.mxu0 %v5329_v29 }
 0x381   :  { %v1797_v44 = vsub.f32 %v4763_v35, %v1781_v54  ;;  %1896 = vadd.xlane.f32.xlu1 %v1895_v6  ;;  %v1904_v30 = vsel %vm1525_vm3, %v4050_v13, 0.0  ;;  %v2133_v18 = vpack.c.bf16 %v4050_v13, %v4050_v13  ;;  %v1626_v3 = vmul.f32 1.442695, %v5351_v50  ;;  %v5352_v54 = vld [vmem:[#allocation13_spill] sm:$0xff]  ;;  %v5353_v13 = vld [vmem:[#allocation14_spill] sm:$0xff] }
 0x382   :  { %1905 = vadd.xlane.f32.xlu0 %v1904_v30  ;;  %3873 = vmatmul.mubr.msk.bf16.vlgmr.msra.gmra.mrb[68].mxu1 %vm2135_vm5, %v2130_v56  ;;  %v5354_v6 = vsub.f32 %v5352_v54, %v5353_v13  ;;  %v5355_v30 = vld [vmem:[#allocation15_spill] sm:$0xff] }
 0x383   :  { %v1828_v9 = vmul.f32 1.442695, %v1797_v44  ;;  %3883 = vmatpush3.bf16.msra.mxu1 %v2739_v41  ;;  %3884 = vmatprep.mubr.msk.bf16.mxu1 %vm4149_vm0, %v5329_v29 }
 0x384   :  { %3894 = vmatprep.subr.bf16.mxu1 %v5329_v29  ;;  %v1630_v56 = vmul.f32 1.442695, %v5354_v6 }
 0x385   :  { %4053 = vpow2.f32 %v1828_v9  ;;  %v5356_v9 = vld [vmem:[#allocation16_spill] sm:$0xff] }
 0x386   :  { %3879 = vmatmul.mubr.msk.bf16.vlgmr.msra.gmra.mrb[52].mxu0 %vm2135_vm5, %v2131_v27  ;;  %4055 = vpow2.f32 %v1606_v51  ;;  %v5357_v27 = vsub.f32 %v5355_v30, %v5356_v9  ;;  %v1830_v51 = vld [vmem:[#allocation3] sm:$0x1]  ;;  %v1842_v30 = vld [vmem:[#allocation3 + $0xc] sm:$0x1] }
 0x387   :  { %v4052_v8 = vpop.eup %4051  ;;  %3889 = vmatpush3.bf16.msra.mxu0 %v2785_v38  ;;  %3890 = vmatprep.mubr.msk.bf16.mxu0 %vm4149_vm0, %v5329_v29  ;;  %4057 = vpow2.f32 %v1612_v39 }
 0x388   :  { %v1901_v35 = vsel %vm1525_vm3, %v4052_v8, 0.0  ;;  %v2132_v24 = vpack.c.bf16 %v4052_v8, %v4052_v8  ;;  %4059 = vpow2.f32 %v1616_v36  ;;  %v1634_v38 = vmul.f32 1.442695, %v5357_v27 }
 0x389   :  { %1902 = vadd.xlane.f32.xlu1 %v1901_v35 }
 0x38a   :  { %3885 = vmatmul.mubr.msk.bf16.vlgmr.msra.gmra.mrb[72].mxu1 %vm2135_vm5, %v2132_v24 }
 0x38b   :  { %3895 = vmatpush3.bf16.msra.mxu1 %v2831_v31  ;;  %3896 = vmatprep.mubr.msk.bf16.mxu1 %vm4149_vm0, %v5329_v29  ;;  %v5333_v29 = vsub.f32 %v4777_v16, %v4780_v0  ;;  %v5337_v16 = vsub.f32 %v4782_v58, %v4790_v7  ;;  %v5340_v58 = vld [vmem:[#allocation17_spill] sm:$0xff]  ;;  %v5341_v7 = vld [vmem:[#allocation18_spill] sm:$0xff] }
 0x38c   :  { %v5342_v14 = vsub.f32 %v5340_v58, %v5341_v7  ;;  %v1832_v58 = vld [vmem:[#allocation3 + $0x2] sm:$0x1]  ;;  %v1837_v7 = vld [vmem:[#allocation3 + $0x7] sm:$0x1] }
 0x38d   :  { %v1608_v2 = vmul.f32 1.442695, %v5333_v29  ;;  %v1614_v0 = vmul.f32 1.442695, %v5337_v16  ;;  %v1834_v29 = vld [vmem:[#allocation3 + $0x4] sm:$0x1] }
 0x38e   :  { %3891 = vmatmul.mubr.msk.bf16.vlgmr.msra.gmra.mrb[56].mxu0 %vm2135_vm5, %v2133_v18  ;;  %v1632_v63 = vmul.f32 1.442695, %v5342_v14 }
 0x38f   :  { %v4054_v11 = vpop.eup %4053  ;;  %4061 = vpow2.f32 %v1608_v2 }
 0x390   :  { %v1907_v21 = vsel %vm1525_vm3, %v4054_v11, 0.0  ;;  %v2134_v45 = vpack.c.bf16 %v4054_v11, %v4054_v11  ;;  %v4056_v59 = vpop.eup %4055  ;;  %4063 = vpow2.f32 %v1620_v43 }
 0x391   :  { %1908 = vadd.xlane.f32.xlu1 %v1907_v21  ;;  %v4058_v53 = vpop.eup %4057  ;;  %4065 = vpow2.f32 %v1610_v15  ;;  %v1846_v18 = vmul.f32 %v4056_v59, %v1830_v51  ;;  %v1833_v21 = vld [vmem:[#allocation3 + $0x3] sm:$0x1]  ;;  %v1835_v15 = vld [vmem:[#allocation3 + $0x5] sm:$0x1] }
 0x392   :  { %3897 = vmatmul.mubr.msk.bf16.vlgmr.msra.gmra.mrb[76].mxu1 %vm2135_vm5, %v2134_v45  ;;  %4067 = vpow2.f32 %v1624_v40  ;;  %v5102_v48 = vpop.eup %4059  ;;  %v1849_v52 = vmul.f32 %v4058_v53, %v1833_v21 }
 0x393   :  { %4069 = vpow2.f32 %v1614_v0  ;;  %v1851_v40 = vmul.f32 %v5102_v48, %v1835_v15 }
 0x394   :  { %4071 = vpow2.f32 %v1628_v17 }
 0x395   :  { %4073 = vpow2.f32 %v1618_v23 }
 0x396   :  { %4075 = vpow2.f32 %v1632_v63 }
 0x397   :  { %4077 = vpow2.f32 %v1622_v4 }
 0x398   :  { %1961 = vperm.xlu0 %3920, %v4056_v59   ;;  %4079 = vpow2.f32 %v1636_v47 }
 0x399   :  { %v4062_v37 = vpop.eup %4061  ;;  %4081 = vpow2.f32 %v1626_v3 }
 0x39a   :  { %v5111_v22 = vpop.eup %4063  ;;  %4083 = vpow2.f32 %v1630_v56  ;;  %v1847_v12 = vmul.f32 %v4062_v37, %v1831_v60 }
 0x39b   :  { %v5117_v10 = vpop.eup %4065  ;;  %4085 = vpow2.f32 %v1634_v38 }
 0x39c   :  { %1988 = vperm.xlu0 %3920, %v4058_v53   ;;  %v5123_v34 = vpop.eup %4067 }
 0x39d   :  { %v4070_v26 = vpop.eup %4069 }
 0x39e   :  { %v5129_v46 = vpop.eup %4071  ;;  %v1850_v32 = vmul.f32 %v4070_v26, %v1834_v29 }
 0x39f   :  { %v4074_v41 = vpop.eup %4073 }
 0x3a0   :  { %2006 = vperm.xlu0 %3920, %v5102_v48   ;;  %v5135_v44 = vpop.eup %4075  ;;  %v1852_v19 = vmul.f32 %v4074_v41, %v1836_v49  ;;  %v1853_v48 = vmul.f32 %v5111_v22, %v1837_v7 }
 0x3a1   :  { %v4078_v8 = vpop.eup %4077 }
 0x3a2   :  { %1970 = vperm.xlu1 %3921, %v4062_v37   ;;  %v5141_v35 = vpop.eup %4079  ;;  %v1848_v37 = vmul.f32 %v5117_v10, %v1832_v58  ;;  %v1854_v25 = vmul.f32 %v4078_v8, %v1838_v55  ;;  %v1845_v58 = vld [vmem:[#allocation3 + $0xf] sm:$0x1] }
 0x3a3   :  { %v5144_v24 = vpop.eup %4081 }
 0x3a4   :  { %2024 = vperm.xlu0 %3920, %v5111_v22   ;;  %v5147_v31 = vpop.eup %4083  ;;  %v1855_v22 = vmul.f32 %v5123_v34, %v1839_v61 }
 0x3a5   :  { %v5150_v42 = vpop.eup %4085 }
 0x3a6   :  { %1979 = vperm.xlu1 %3921, %v5117_v10   ;;  %v1840_v10 = vld [vmem:[#allocation3 + $0xa] sm:$0x1] }
 0x3a7   :  { %v1856_v54 = vmul.f32 %v5144_v24, %v1840_v10 }
 0x3a8   :  { %2042 = vperm.xlu0 %3920, %v5123_v34   ;;  %v1858_v34 = vmul.f32 %v5147_v31, %v1842_v30  ;;  %v1945_v30 = vld [vmem:[#allocation4 + $0x2] sm:$0x1] }
 0x3aa   :  { %1997 = vperm.xlu1 %3921, %v4070_v26  }
 0x3ac   :  { %2060 = vperm.xlu0 %3920, %v5129_v46  }
 0x3ae   :  { %2015 = vperm.xlu1 %3921, %v4074_v41  }
 0x3b0   :  { %2078 = vperm.xlu0 %3920, %v5135_v44  }
 0x3b2   :  { %2033 = vperm.xlu1 %3921, %v4078_v8   ;;  %v1841_v8 = vld [vmem:[#allocation3 + $0xb] sm:$0x1] }
 0x3b4   :  { %2096 = vperm.xlu0 %3920, %v5141_v35  }
 0x3b6   :  { %2051 = vperm.xlu1 %3921, %v5144_v24  }
 0x3ba   :  { %2069 = vperm.xlu1 %3921, %v5147_v31  }
 0x3be   :  { %2087 = vperm.xlu1 %3921, %v5150_v42  }
 0x3d6   :  { %v1864_v5 = vpop.xlane.xlu1 %1863 }
 0x3d7   :  { %v1910_v39 = vadd.f32 %v1864_v5, %v1846_v18  ;;  %v1844_v18 = vld [vmem:[#allocation3 + $0xe] sm:$0x1] }
 0x3d9   :  { %1927 = vst.msk [vmem:[#allocation3] sm:$0x1] %vm617_vm1, %v1910_v39 }
 0x3e0   :  { %v2940_v11 = vld [vmem:[#allocation3] sm:$0x1] }
 0x3e1   :  { %4087 = vrcp.f32 %v2940_v11  ;;  %v1857_v11 = vmul.f32 %v5129_v46, %v1841_v8  ;;  %v1843_v46 = vld [vmem:[#allocation3 + $0xd] sm:$0x1]  ;;  %v3989_v8 = vld [vmem:[%s5296_s7 + $0x48] sm:$0xff]  }
 0x3eb   :  { %v4088_v45 = vpop.eup %4087 }
 0x3ec   :  { %2974 = vperm.xlu1 %3921, %v4088_v45   ;;  %v1860_v45 = vmul.f32 %v5150_v42, %v1844_v18  ;;  %v1859_v42 = vmul.f32 %v5135_v44, %v1843_v46  ;;  %v3994_v46 = vld [vmem:[%s5296_s7 + $0x18] sm:$0xff]  }
 0x3ee   :  { %v1873_v36 = vpop.xlane.xlu1 %1872 }
 0x3ef   :  { %v1913_v2 = vadd.f32 %v1873_v36, %v1849_v52 }
 0x3f1   :  { %1930 = vst.msk [vmem:[#allocation3 + $0x3] sm:$0x1] %vm617_vm1, %v1913_v2 }
 0x3f2   :  { %v1876_v43 = vpop.xlane.xlu0 %1875 }
 0x3f3   :  { %v1914_v59 = vadd.f32 %v1876_v43, %v1850_v32 }
 0x3f5   :  { %1931 = vst.msk [vmem:[#allocation3 + $0x4] sm:$0x1] %vm617_vm1, %v1914_v59 }
 0x3f6   :  { %v1867_v16 = vpop.xlane.xlu0 %1866  ;;  %v1879_v0 = vpop.xlane.xlu1 %1878 }
 0x3f7   :  { %v1911_v17 = vadd.f32 %v1867_v16, %v1847_v12  ;;  %v1915_v53 = vadd.f32 %v1879_v0, %v1851_v40 }
 0x3f8   :  { %v2943_v47 = vld [vmem:[#allocation3 + $0x3] sm:$0x1] }
 0x3f9   :  { %1928 = vst.msk [vmem:[#allocation3 + $0x1] sm:$0x1] %vm617_vm1, %v1911_v17  ;;  %1932 = vst.msk [vmem:[#allocation3 + $0x5] sm:$0x1] %vm617_vm1, %v1915_v53 }
 0x3fa   :  { %v1882_v23 = vpop.xlane.xlu0 %1881 }
 0x3fb   :  { %v1916_v14 = vadd.f32 %v1882_v23, %v1852_v19  ;;  %v1943_v19 = vld [vmem:[#allocation4] sm:$0x1] }
 0x3fc   :  { %v2944_v63 = vld [vmem:[#allocation3 + $0x4] sm:$0x1] }
 0x3fd   :  { %1933 = vst.msk [vmem:[#allocation3 + $0x6] sm:$0x1] %vm617_vm1, %v1916_v14  ;;  %4089 = vrcp.f32 %v2944_v63 }
 0x3fe   :  { %v1870_v57 = vpop.xlane.xlu0 %1869  ;;  %v1885_v1 = vpop.xlane.xlu1 %1884 }
 0x3ff   :  { %v1912_v4 = vadd.f32 %v1870_v57, %v1848_v37  ;;  %v1917_v20 = vadd.f32 %v1885_v1, %v1853_v48  ;;  %v1861_v37 = vmul.f32 %v5141_v35, %v1845_v58  ;;  %v3995_v58 = vld [vmem:[%s5296_s7 + $0x60] sm:$0xff]  }
 0x400   :  { %v2941_v33 = vld [vmem:[#allocation3 + $0x1] sm:$0x1]  ;;  %v2945_v26 = vld [vmem:[#allocation3 + $0x5] sm:$0x1] }
 0x401   :  { %1929 = vst.msk [vmem:[#allocation3 + $0x2] sm:$0x1] %vm617_vm1, %v1912_v4  ;;  %1934 = vst.msk [vmem:[#allocation3 + $0x7] sm:$0x1] %vm617_vm1, %v1917_v20  ;;  %4091 = vrcp.f32 %v2941_v33 }
 0x402   :  { %v1888_v28 = vpop.xlane.xlu0 %1887  ;;  %4093 = vrcp.f32 %v2943_v47 }
 0x403   :  { %v1918_v50 = vadd.f32 %v1888_v28, %v1854_v25  ;;  %v1944_v28 = vld [vmem:[#allocation4 + $0x1] sm:$0x1] }
 0x404   :  { %v2946_v3 = vld [vmem:[#allocation3 + $0x6] sm:$0x1] }
 0x405   :  { %1935 = vst.msk [vmem:[#allocation3 + $0x8] sm:$0x1] %vm617_vm1, %v1918_v50  ;;  %4095 = vrcp.f32 %v2946_v3 }
 0x406   :  { %v1891_v13 = vpop.xlane.xlu1 %1890  ;;  %4097 = vrcp.f32 %v2945_v26 }
 0x407   :  { %v4090_v6 = vpop.eup %4089  ;;  %v1894_v56 = vpop.xlane.xlu0 %1893  ;;  %v1919_v41 = vadd.f32 %v1891_v13, %v1855_v22 }
 0x408   :  { %v1920_v9 = vadd.f32 %v1894_v56, %v1856_v54  ;;  %3010 = vperm.xlu1 %3921, %v4090_v6   ;;  %v2942_v27 = vld [vmem:[#allocation3 + $0x2] sm:$0x1]  ;;  %v2947_v38 = vld [vmem:[#allocation3 + $0x7] sm:$0x1] }
 0x409   :  { %1936 = vst.msk [vmem:[#allocation3 + $0x9] sm:$0x1] %vm617_vm1, %v1919_v41  ;;  %4099 = vrcp.f32 %v2942_v27  ;;  %v3988_v27 = vld [vmem:[%s5296_s7] sm:$0xff]  }
 0x40a   :  { %1937 = vst.msk [vmem:[#allocation3 + $0xa] sm:$0x1] %vm617_vm1, %v1920_v9  ;;  %4101 = vrcp.f32 %v2947_v38  ;;  %v3987_v9 = vld [vmem:[%s5296_s7 + $0x40] sm:$0xff]  }
 0x40b   :  { %v4092_v51 = vpop.eup %4091  ;;  %v1900_v24 = vpop.xlane.xlu0 %1899  ;;  %3646 = vmatprep.subr.bf16.mxu0 %v3987_v9 }
 0x40c   :  { %v1922_v5 = vadd.f32 %v1900_v24, %v1858_v34  ;;  %2983 = vperm.xlu0 %3920, %v4092_v51   ;;  %v2948_v39 = vld [vmem:[#allocation3 + $0x8] sm:$0x1]  ;;  %v4094_v21 = vpop.eup %4093  ;;  %3647 = vmatpush3.bf16.msra.mxu0 %v3988_v27  ;;  %v3990_v51 = vld [vmem:[%s5296_s7 + $0x8] sm:$0xff]  }
 0x40d   :  { %4103 = vrcp.f32 %v2948_v39  ;;  %3648 = vmatprep.subr.bf16.mxu0 %v3989_v8 }
 0x40e   :  { %1939 = vst.msk [vmem:[#allocation3 + $0xc] sm:$0x1] %vm617_vm1, %v1922_v5  ;;  %v1897_v52 = vpop.xlane.xlu1 %1896 }
 0x40f   :  { %v4096_v36 = vpop.eup %4095  ;;  %v1906_v29 = vpop.xlane.xlu0 %1905  ;;  %v1921_v31 = vadd.f32 %v1897_v52, %v1857_v11 }
 0x410   :  { %v1924_v2 = vadd.f32 %v1906_v29, %v1860_v45  ;;  %3028 = vperm.xlu1 %3921, %v4096_v36   ;;  %3001 = vperm.xlu0 %3920, %v4094_v21   ;;  %v2949_v32 = vld [vmem:[#allocation3 + $0x9] sm:$0x1]  ;;  %v4098_v60 = vpop.eup %4097  ;;  %v1946_v36 = vld [vmem:[#allocation4 + $0x3] sm:$0x1]  ;;  %v3991_v29 = vld [vmem:[%s5296_s7 + $0x50] sm:$0xff]  }
 0x411   :  { %1938 = vst.msk [vmem:[#allocation3 + $0xb] sm:$0x1] %vm617_vm1, %v1921_v31  ;;  %v2950_v43 = vld [vmem:[#allocation3 + $0xa] sm:$0x1]  ;;  %4105 = vrcp.f32 %v2949_v32  ;;  %3649 = vmatpush3.bf16.msra.mxu0 %v3990_v51  ;;  %v3992_v31 = vld [vmem:[%s5296_s7 + $0x10] sm:$0xff]  }
 0x412   :  { %1941 = vst.msk [vmem:[#allocation3 + $0xe] sm:$0x1] %vm617_vm1, %v1924_v2  ;;  %4107 = vrcp.f32 %v2950_v43  ;;  %v3993_v2 = vld [vmem:[%s5296_s7 + $0x58] sm:$0xff]   ;;  %3650 = vmatprep.subr.bf16.mxu0 %v3991_v29  ;;  %v1951_v51 = vld [vmem:[#allocation4 + $0x8] sm:$0x1] }
 0x413   :  { %v4100_v15 = vpop.eup %4099 }
 0x414   :  { %2992 = vperm.xlu1 %3921, %v4100_v15   ;;  %3019 = vperm.xlu0 %3920, %v4098_v60   ;;  %v4102_v12 = vpop.eup %4101 }
 0x415   :  { %v2952_v59 = vld [vmem:[#allocation3 + $0xc] sm:$0x1]  ;;  %3651 = vmatpush3.bf16.msra.mxu0 %v3992_v31 }
 0x416   :  { %v1903_v40 = vpop.xlane.xlu1 %1902  ;;  %4109 = vrcp.f32 %v2952_v59  ;;  %v1947_v59 = vld [vmem:[#allocation4 + $0x4] sm:$0x1]  ;;  %3652 = vmatprep.subr.bf16.mxu0 %v3993_v2 }
 0x417   :  { %v4104_v16 = vpop.eup %4103  ;;  %v1962_v0 = vpop.permute.xlu0 %1961  ;;  %v1923_v49 = vadd.f32 %v1903_v40, %v1859_v42 }
 0x418   :  { %v1967_v17 = vrot.slane %v1962_v0, %v4433_v62  ;;  %3046 = vperm.xlu1 %3921, %v4104_v16   ;;  %3037 = vperm.xlu0 %3920, %v4102_v12   ;;  %v2951_v53 = vld [vmem:[#allocation3 + $0xb] sm:$0x1] }
 0x419   :  { %1940 = vst.msk [vmem:[#allocation3 + $0xd] sm:$0x1] %vm617_vm1, %v1923_v49  ;;  %v2954_v23 = vld [vmem:[#allocation3 + $0xe] sm:$0x1]  ;;  %4111 = vrcp.f32 %v2951_v53  ;;  %3653 = vmatpush3.bf16.msra.mxu0 %v3994_v46 }
 0x41a   :  { %4113 = vrcp.f32 %v2954_v23  ;;  %v2103_v14 = vmul.f32 %v1967_v17, %v1943_v19  ;;  %v1948_v23 = vld [vmem:[#allocation4 + $0x5] sm:$0x1]  ;;  %3654 = vmatprep.subr.bf16.mxu0 %v3995_v58 }
 0x41b   :  { %v4106_v44 = vpop.eup %4105  ;;  %v1989_v24 = vpop.permute.xlu0 %1988 }
 0x41c   :  { %v4108_v7 = vpop.eup %4107  ;;  %3055 = vperm.xlu0 %3920, %v4106_v44   ;;  %v1994_v21 = vrot.slane %v1989_v24, %v4433_v62 }
 0x41d   :  { %3064 = vperm.xlu1 %3921, %v4108_v7   ;;  %v2177_v63 = vpop.f32.mrb[28].mxu0 }
 0x41e   :  { %v2873_v48 = vadd.f32 %v2177_v63, %v2103_v14  ;;  %v3808_v57 = vpop.f32.mrb[29].mxu0  ;;  %v1909_v1 = vpop.xlane.xlu1 %1908  ;;  %v2106_v60 = vmul.f32 %v1994_v21, %v1946_v36  ;;  %v3996_v14 = vld [vmem:[%s5296_s7 + $0x20] sm:$0xff]   ;;  %v1952_v36 = vld [vmem:[#allocation4 + $0x9] sm:$0x1] }
 0x41f   :  { %v1925_v55 = vadd.f32 %v1909_v1, %v1861_v37  ;;  %v2180_v4 = vpop.f32.mrb[30].mxu0  ;;  %v2007_v15 = vpop.permute.xlu0 %2006  ;;  %3655 = vmatpush3.bf16.msra.mxu0 %v3996_v14  ;;  %v3997_v1 = vld [vmem:[%s5296_s7 + $0x68] sm:$0xff]  }
 0x420   :  { %v4110_v20 = vpop.eup %4109  ;;  %2889 = vst [vmem:[#allocation4] sm:$0x1] %v2873_v48  ;;  %v3809_v33 = vpop.f32.mrb[31].mxu0  ;;  %v2953_v25 = vld [vmem:[#allocation3 + $0xd] sm:$0x1]  ;;  %v2012_v0 = vrot.slane %v2007_v15, %v4433_v62  ;;  %3656 = vmatprep.subr.bf16.mxu0 %v3997_v1 }
 0x421   :  { %1942 = vst.msk [vmem:[#allocation3 + $0xf] sm:$0x1] %vm617_vm1, %v1925_v55  ;;  %3082 = vperm.xlu1 %3921, %v4110_v20   ;;  %4115 = vrcp.f32 %v2953_v25  ;;  %v3998_v55 = vld [vmem:[%s5296_s7 + $0x28] sm:$0xff]   ;;  %v1949_v33 = vld [vmem:[#allocation4 + $0x6] sm:$0x1]  ;;  %v3999_v25 = vld [vmem:[%s5296_s7 + $0x70] sm:$0xff]  }
 0x422   :  { %v1971_v47 = vpop.permute.xlu1 %1970  ;;  %v2108_v57 = vmul.f32 %v2012_v0, %v1948_v23 }
 0x423   :  { %v4112_v61 = vpop.eup %4111  ;;  %v1976_v50 = vrot.slane %v1971_v47, %v4433_v62  ;;  %v2025_v4 = vpop.permute.xlu0 %2024  ;;  %3657 = vmatpush3.bf16.msra.mxu0 %v3998_v55 }
 0x424   :  { %v4114_v10 = vpop.eup %4113  ;;  %3073 = vperm.xlu0 %3920, %v4112_v61   ;;  %3658 = vmatprep.subr.bf16.mxu0 %v3999_v25 }
 0x425   :  { %3100 = vperm.xlu1 %3921, %v4114_v10   ;;  %v2104_v35 = vmul.f32 %v1976_v50, %v1944_v28  ;;  %v2223_v3 = vpop.f32.mrb[48].mxu1  ;;  %v2030_v50 = vrot.slane %v2025_v4, %v4433_v62 }
 0x426   :  { %v1980_v22 = vpop.permute.xlu1 %1979  ;;  %v3814_v26 = vpop.f32.mrb[49].mxu1 }
 0x427   :  { %v2874_v54 = vadd.f32 %v2223_v3, %v2104_v35  ;;  %v2226_v13 = vpop.f32.mrb[50].mxu1  ;;  %v1985_v6 = vrot.slane %v1980_v22, %v4433_v62  ;;  %v4000_v3 = vld [vmem:[%s5296_s7 + $0x30] sm:$0xff]  }
 0x428   :  { %v3815_v56 = vpop.f32.mrb[51].mxu1  ;;  %v2955_v41 = vld [vmem:[#allocation3 + $0xf] sm:$0x1]  ;;  %3659 = vmatpush3.bf16.msra.mxu0 %v4000_v3 }
 0x429   :  { %2890 = vst [vmem:[#allocation4 + $0x1] sm:$0x1] %v2874_v54  ;;  %4117 = vrcp.f32 %v2955_v41  ;;  %v2105_v34 = vmul.f32 %v1985_v6, %v1945_v30  ;;  %v1950_v54 = vld [vmem:[#allocation4 + $0x7] sm:$0x1]  ;;  %v4001_v13 = vld [vmem:[%s5296_s7 + $0x78] sm:$0xff]  }
 0x42a   :  { %v1998_v52 = vpop.permute.xlu1 %1997  ;;  %v2110_v27 = vmul.f32 %v2030_v50, %v1950_v54  ;;  %3660 = vmatprep.subr.bf16.mxu0 %v4001_v13 }
 0x42b   :  { %v4116_v38 = vpop.eup %4115  ;;  %v2003_v43 = vrot.slane %v1998_v52, %v4433_v62 }
 0x42c   :  { %3091 = vperm.xlu0 %3920, %v4116_v38   ;;  %v4002_v38 = vld [vmem:[%s5296_s7 + $0x38] sm:$0xff]   ;;  %s4152_s7 = smov [#allocation5]  }
 0x42d   :  { %v2269_v18 = vpop.f32.mrb[32].mxu0  ;;  %v2107_v17 = vmul.f32 %v2003_v43, %v1947_v59  ;;  %3661 = vmatpush3.bf16.msra.mxu0 %v4002_v38  ;;  %s3447_s19 = sshll.u32 %s4152_s7, 4  ;;  %s3448_s19 = int_to_ptr.vmem [resolvable:$true] %s3447_s19 }
 0x42e   :  { %v2875_v5 = vadd.f32 %v2269_v18, %v2105_v34  ;;  %v3820_v39 = vpop.f32.mrb[33].mxu0  ;;  %v2016_v53 = vpop.permute.xlu1 %2015  ;;  %s4123_s20 = scalar_lea.vmem %s3448_s19, 256  ;;  %p4128_p1 = scmp.lt.s32.totalorder %s3448_s19, %s3448_s19 }
 0x42f   :  { %v2272_v11 = vpop.f32.mrb[34].mxu0  ;;  %v2021_v37 = vrot.slane %v2016_v53, %v4433_v62  ;;  %v2043_v34 = vpop.permute.xlu0 %2042  ;;  %p4124_p0 = scmp.ne.s32.totalorder %s3448_s19, %s4123_s20  ;;  %p4129_p2 = scmp.lt.s32.totalorder %s4123_s20, %s4123_s20 }
 0x430   :  { %2891 = vst [vmem:[#allocation4 + $0x2] sm:$0x1] %v2875_v5  ;;  %v3821_v45 = vpop.f32.mrb[35].mxu0  ;;  %v2048_v39 = vrot.slane %v2043_v34, %v4433_v62 }
 0x431   :  { %v2109_v35 = vmul.f32 %v2021_v37, %v1949_v33  ;;  %p4130_p3 = por %p4129_p2, %p4128_p1 }
 0x432   :  { %v2034_v22 = vpop.permute.xlu1 %2033 }
 0x433   :  { %v4118_v32 = vpop.eup %4117  ;;  %v2039_v30 = vrot.slane %v2034_v22, %v4433_v62  ;;  %v2061_v46 = vpop.permute.xlu0 %2060  ;;  %p4131_p4 = pnand %p4130_p3, %p4124_p0 }
 0x434   :  { %3109 = vperm.xlu0 %3920, %v4118_v32  }
 0x435   :  { %v2315_v42 = vpop.f32.mrb[52].mxu1  ;;  %v2111_v21 = vmul.f32 %v2039_v30, %v1951_v51 }
 0x436   :  { %v2876_v12 = vadd.f32 %v2315_v42, %v2106_v60  ;;  %v3826_v40 = vpop.f32.mrb[53].mxu1  ;;  %v2052_v45 = vpop.permute.xlu1 %2051  ;;  %v2112_v60 = vmul.f32 %v2048_v39, %v1952_v36  ;;  %v1953_v42 = vld [vmem:[#allocation4 + $0xa] sm:$0x1] }
 0x437   :  { %v2318_v16 = vpop.f32.mrb[54].mxu1  ;;  %v2057_v32 = vrot.slane %v2052_v45, %v4433_v62  ;;  %v2079_v37 = vpop.permute.xlu0 %2078 }
 0x438   :  { %2892 = vst [vmem:[#allocation4 + $0x3] sm:$0x1] %v2876_v12  ;;  %v3827_v49 = vpop.f32.mrb[55].mxu1  ;;  %v2066_v16 = vrot.slane %v2061_v46, %v4433_v62 }
 0x439   :  { %v2361_v19 = vpop.f32.mrb[36].mxu0  ;;  %v2113_v49 = vmul.f32 %v2057_v32, %v1953_v42 }
 0x43a   :  { %v2877_v44 = vadd.f32 %v2361_v19, %v2107_v17  ;;  %v3832_v7 = vpop.f32.mrb[37].mxu0  ;;  %v2070_v17 = vpop.permute.xlu1 %2069  ;;  %v1954_v19 = vld [vmem:[#allocation4 + $0xb] sm:$0x1] }
 0x43b   :  { %v2364_v63 = vpop.f32.mrb[38].mxu0  ;;  %v2075_v7 = vrot.slane %v2070_v17, %v4433_v62  ;;  %v2097_v54 = vpop.permute.xlu0 %2096 }
 0x43c   :  { %2893 = vst [vmem:[#allocation4 + $0x4] sm:$0x1] %v2877_v44  ;;  %v3833_v48 = vpop.f32.mrb[39].mxu0  ;;  %v2114_v63 = vmul.f32 %v2066_v16, %v1954_v19 }
 0x43d   :  { %v2407_v20 = vpop.f32.mrb[56].mxu1 }
 0x43e   :  { %v2878_v47 = vadd.f32 %v2407_v20, %v2108_v57  ;;  %v3838_v28 = vpop.f32.mrb[57].mxu1  ;;  %v1955_v57 = vld [vmem:[#allocation4 + $0xc] sm:$0x1]  ;;  %v2084_v20 = vrot.slane %v2079_v37, %v4433_v62  ;;  %v2926_v37 = vld [vmem:[#allocation4 + $0x2] sm:$0x1] }
 0x43f   :  { %v2410_v61 = vpop.f32.mrb[58].mxu1  ;;  %v2115_v25 = vmul.f32 %v2075_v7, %v1955_v57 }
 0x440   :  { %2894 = vst [vmem:[#allocation4 + $0x5] sm:$0x1] %v2878_v47  ;;  %v3839_v10 = vpop.f32.mrb[59].mxu1  ;;  %v2088_v47 = vpop.permute.xlu1 %2087  ;;  %v1956_v61 = vld [vmem:[#allocation4 + $0xd] sm:$0x1] }
 0x441   :  { %v2453_v26 = vpop.f32.mrb[40].mxu0  ;;  %v2093_v3 = vrot.slane %v2088_v47, %v4433_v62 }
 0x442   :  { %v2879_v6 = vadd.f32 %v2453_v26, %v2109_v35  ;;  %v3844_v56 = vpop.f32.mrb[41].mxu0  ;;  %v2116_v26 = vmul.f32 %v2084_v20, %v1956_v61  ;;  %v2927_v61 = vld [vmem:[#allocation4 + $0x3] sm:$0x1] }
 0x443   :  { %v2456_v41 = vpop.f32.mrb[42].mxu0  ;;  %v2928_v47 = vld [vmem:[#allocation4 + $0x4] sm:$0x1] }
 0x444   :  { %2895 = vst [vmem:[#allocation4 + $0x6] sm:$0x1] %v2879_v6  ;;  %v3845_v9 = vpop.f32.mrb[43].mxu0  ;;  %v1957_v6 = vld [vmem:[#allocation4 + $0xe] sm:$0x1] }
 0x445   :  { %v2499_v8 = vpop.f32.mrb[60].mxu1  ;;  %v2102_v9 = vrot.slane %v2097_v54, %v4433_v62  ;;  %v2117_v38 = vmul.f32 %v2093_v3, %v1957_v6 }
 0x446   :  { %v2880_v24 = vadd.f32 %v2499_v8, %v2110_v27  ;;  %v3850_v18 = vpop.f32.mrb[61].mxu1  ;;  %v1958_v8 = vld [vmem:[#allocation4 + $0xf] sm:$0x1] }
 0x447   :  { %v2502_v5 = vpop.f32.mrb[62].mxu1  ;;  %v2118_v39 = vmul.f32 %v2102_v9, %v1958_v8 }
 0x448   :  { %2896 = vst [vmem:[#allocation4 + $0x7] sm:$0x1] %v2880_v24  ;;  %v3851_v11 = vpop.f32.mrb[63].mxu1 }
 0x449   :  { %v2545_v52 = vpop.f32.mrb[44].mxu0 }
 0x44a   :  { %v2881_v29 = vadd.f32 %v2545_v52, %v2111_v21  ;;  %v3856_v31 = vpop.f32.mrb[45].mxu0 }
 0x44b   :  { %v2548_v2 = vpop.f32.mrb[46].mxu0 }
 0x44c   :  { %2897 = vst [vmem:[#allocation4 + $0x8] sm:$0x1] %v2881_v29  ;;  %v3857_v43 = vpop.f32.mrb[47].mxu0 }
 0x44d   :  { %v2591_v15 = vpop.f32.mrb[64].mxu1 }
 0x44e   :  { %v2882_v59 = vadd.f32 %v2591_v15, %v2112_v60  ;;  %v3862_v12 = vpop.f32.mrb[65].mxu1 }
 0x44f   :  { %v2594_v40 = vpop.f32.mrb[66].mxu1  ;;  %v2931_v7 = vld [vmem:[#allocation4 + $0x7] sm:$0x1] }
 0x450   :  { %2898 = vst [vmem:[#allocation4 + $0x9] sm:$0x1] %v2882_v59  ;;  %v3863_v0 = vpop.f32.mrb[67].mxu1 }
 0x451   :  { %v2637_v53 = vpop.f32.mrb[48].mxu0 }
 0x452   :  { %v2883_v23 = vadd.f32 %v2637_v53, %v2113_v49  ;;  %v3868_v58 = vpop.f32.mrb[49].mxu0 }
 0x453   :  { %v2640_v44 = vpop.f32.mrb[50].mxu0 }
 0x454   :  { %2899 = vst [vmem:[#allocation4 + $0xa] sm:$0x1] %v2883_v23  ;;  %v3869_v14 = vpop.f32.mrb[51].mxu0 }
 0x455   :  { %v2683_v48 = vpop.f32.mrb[68].mxu1 }
 0x456   :  { %v2884_v1 = vadd.f32 %v2683_v48, %v2114_v63  ;;  %v3874_v55 = vpop.f32.mrb[69].mxu1  ;;  %v2929_v63 = vld [vmem:[#allocation4 + $0x5] sm:$0x1] }
 0x457   :  { %v2686_v4 = vpop.f32.mrb[70].mxu1 }
 0x458   :  { %2900 = vst [vmem:[#allocation4 + $0xb] sm:$0x1] %v2884_v1  ;;  %v3875_v33 = vpop.f32.mrb[71].mxu1  ;;  %v2930_v4 = vld [vmem:[#allocation4 + $0x6] sm:$0x1] }
 0x459   :  { %v2729_v28 = vpop.f32.mrb[52].mxu0 }
 0x45a   :  { %v2885_v50 = vadd.f32 %v2729_v28, %v2115_v25  ;;  %v3880_v10 = vpop.f32.mrb[53].mxu0  ;;  %v2925_v28 = vld [vmem:[#allocation4 + $0x1] sm:$0x1] }
 0x45b   :  { %v2732_v35 = vpop.f32.mrb[54].mxu0  ;;  %v2934_v6 = vld [vmem:[#allocation4 + $0xa] sm:$0x1] }
 0x45c   :  { %2901 = vst [vmem:[#allocation4 + $0xc] sm:$0x1] %v2885_v50  ;;  %v3881_v22 = vpop.f32.mrb[55].mxu0 }
 0x45d   :  { %v2775_v13 = vpop.f32.mrb[72].mxu1 }
 0x45e   :  { %v2886_v56 = vadd.f32 %v2775_v13, %v2116_v26  ;;  %v3886_v41 = vpop.f32.mrb[73].mxu1  ;;  %v2933_v13 = vld [vmem:[#allocation4 + $0x9] sm:$0x1] }
 0x45f   :  { %v2778_v30 = vpop.f32.mrb[74].mxu1  ;;  %v2935_v25 = vld [vmem:[#allocation4 + $0xb] sm:$0x1]  ;;  %v2924_v41 = vld [vmem:[#allocation4] sm:$0x1] }
 0x460   :  { %2902 = vst [vmem:[#allocation4 + $0xd] sm:$0x1] %v2886_v56  ;;  %v3887_v27 = vpop.f32.mrb[75].mxu1 }
 0x461   :  { %v2821_v34 = vpop.f32.mrb[56].mxu0 }
 0x462   :  { %v2887_v51 = vadd.f32 %v2821_v34, %v2117_v38  ;;  %v3892_v24 = vpop.f32.mrb[57].mxu0 }
 0x463   :  { %v2824_v18 = vpop.f32.mrb[58].mxu0  ;;  %v2932_v24 = vld [vmem:[#allocation4 + $0x8] sm:$0x1] }
 0x464   :  { %2903 = vst [vmem:[#allocation4 + $0xe] sm:$0x1] %v2887_v51  ;;  %v3893_v5 = vpop.f32.mrb[59].mxu0 }
 0x465   :  { %v2867_v11 = vpop.f32.mrb[76].mxu1 }
 0x466   :  { %v2888_v21 = vadd.f32 %v2867_v11, %v2118_v39  ;;  %v3898_v45 = vpop.f32.mrb[77].mxu1 }
 0x467   :  { %v2870_v52 = vpop.f32.mrb[78].mxu1  ;;  %v2937_v18 = vld [vmem:[#allocation4 + $0xd] sm:$0x1] }
 0x468   :  { %2904 = vst [vmem:[#allocation4 + $0xf] sm:$0x1] %v2888_v21  ;;  %v3899_v36 = vpop.f32.mrb[79].mxu1  ;;  %v2936_v52 = vld [vmem:[#allocation4 + $0xc] sm:$0x1] }
 0x46b   :  { %v2975_v29 = vpop.permute.xlu1 %2974 }
 0x46c   :  { %v2980_v55 = vrot.slane %v2975_v29, %v4433_v62  ;;  %v5358_v29 = vld [vmem:[#allocation8_spill] sm:$0xff] }
 0x46e   :  { %v3116_v34 = vmul.f32 %v2980_v55, %v2924_v41 }
 0x487   :  { %v3011_v2 = vpop.permute.xlu1 %3010 }
 0x488   :  { %v3016_v23 = vrot.slane %v3011_v2, %v4433_v62 }
 0x48a   :  { %v3120_v22 = vmul.f32 %v3016_v23, %v2928_v47 }
 0x48b   :  { %v2984_v31 = vpop.permute.xlu0 %2983 }
 0x48c   :  { %v2989_v58 = vrot.slane %v2984_v31, %v4433_v62 }
 0x48e   :  { %v3117_v26 = vmul.f32 %v2989_v58, %v2925_v28 }
 0x48f   :  { %v3002_v32 = vpop.permute.xlu0 %3001  ;;  %v3029_v43 = vpop.permute.xlu1 %3028 }
 0x490   :  { %v3034_v53 = vrot.slane %v3029_v43, %v4433_v62  ;;  %v3007_v44 = vrot.slane %v3002_v32, %v4433_v62  ;;  %v3150_v45 = vcombine.low %v3116_v34, %v3117_v26 }
 0x492   :  { %v3122_v50 = vmul.f32 %v3034_v53, %v2930_v4  ;;  %v3119_v54 = vmul.f32 %v3007_v44, %v2927_v61  ;;  %v3132_v4 = vld [vmem:[#allocation5] sm:$0xff] }
 0x493   :  { %v3020_v60 = vpop.permute.xlu0 %3019  ;;  %v2993_v46 = vpop.permute.xlu1 %2992 }
 0x494   :  { %v3025_v0 = vrot.slane %v3020_v60, %v4433_v62  ;;  %v2998_v49 = vrot.slane %v2993_v46, %v4433_v62 }
 0x496   :  { %v3121_v20 = vmul.f32 %v3025_v0, %v2929_v63  ;;  %v3118_v33 = vmul.f32 %v2998_v49, %v2926_v37  ;;  %v3160_v0 = vrot.slane %v3150_v45, %v5358_v29 }
 0x497   :  { %v3038_v15 = vpop.permute.xlu0 %3037  ;;  %v3047_v42 = vpop.permute.xlu1 %3046 }
 0x498   :  { %v3043_v16 = vrot.slane %v3038_v15, %v4433_v62  ;;  %v3052_v10 = vrot.slane %v3047_v42, %v4433_v62  ;;  %v3152_v8 = vcombine.low %v3120_v22, %v3121_v20  ;;  %v3151_v51 = vcombine.low %v3118_v33, %v3119_v54  ;;  %v2938_v15 = vld [vmem:[#allocation4 + $0xe] sm:$0x1]  ;;  %v2939_v42 = vld [vmem:[#allocation4 + $0xf] sm:$0x1] }
 0x49a   :  { %v3123_v48 = vmul.f32 %v3043_v16, %v2931_v7  ;;  %v3124_v5 = vmul.f32 %v3052_v10, %v2932_v24  ;;  %v3174_v60 = vrot.slane %v3152_v8, %v5358_v29  ;;  %v3167_v46 = vrot.slane %v3151_v51, %v5358_v29 }
 0x49b   :  { %v3056_v59 = vpop.permute.xlu0 %3055 }
 0x49c   :  { %v3065_v12 = vpop.permute.xlu1 %3064  ;;  %v3061_v57 = vrot.slane %v3056_v59, %v4433_v62  ;;  %v3153_v30 = vcombine.low %v3122_v50, %v3123_v48 }
 0x49d   :  { %v3070_v1 = vrot.slane %v3065_v12, %v4433_v62 }
 0x49e   :  { %v3125_v9 = vmul.f32 %v3061_v57, %v2933_v13  ;;  %v3181_v31 = vrot.slane %v3153_v30, %v5358_v29 }
 0x49f   :  { %v3126_v27 = vmul.f32 %v3070_v1, %v2934_v6  ;;  %v3133_v1 = vld [vmem:[#allocation5 + $0x8] sm:$0xff] }
 0x4a0   :  { %v3083_v17 = vpop.permute.xlu1 %3082  ;;  %v3199_v2 = vcombine.low %v3124_v5, %v3125_v9  ;;  %v3183_v49 = vcombine.low %v3174_v60, %v3181_v31  ;;  %v3250_v20 = vpack.c.bf16 %v3133_v1, %v3132_v4 }
 0x4a1   :  { %v3088_v38 = vrot.slane %v3083_v17, %v4433_v62 }
 0x4a2   :  { %v3209_v17 = vrot.slane %v3199_v2, %v5358_v29  ;;  %v3197_v7 = vrot.slane %v3183_v49, %v5358_v29 }
 0x4a3   :  { %v3074_v40 = vpop.permute.xlu0 %3073  ;;  %v3128_v32 = vmul.f32 %v3088_v38, %v2936_v52 }
 0x4a4   :  { %v3079_v19 = vrot.slane %v3074_v40, %v4433_v62  ;;  %v3101_v56 = vpop.permute.xlu1 %3100 }
 0x4a5   :  { %v3106_v11 = vrot.slane %v3101_v56, %v4433_v62 }
 0x4a6   :  { %v3127_v35 = vmul.f32 %v3079_v19, %v2935_v25  ;;  %v3182_v19 = vcombine.low %v3160_v0, %v3167_v46 }
 0x4a7   :  { %v3130_v12 = vmul.f32 %v3106_v11, %v2938_v15 }
 0x4a8   :  { %v3200_v39 = vcombine.low %v3126_v27, %v3127_v35 }
 0x4aa   :  { %v3216_v59 = vrot.slane %v3200_v39, %v5358_v29 }
 0x4ab   :  { %v3092_v14 = vpop.permute.xlu0 %3091 }
 0x4ac   :  { %v3097_v3 = vrot.slane %v3092_v14, %v4433_v62  ;;  %v3231_v23 = vcombine.low %v3209_v17, %v3216_v59  ;;  %v3190_v14 = vrot.slane %v3182_v19, %v5358_v29 }
 0x4ae   :  { %v3129_v21 = vmul.f32 %v3097_v3, %v2937_v18  ;;  %v3239_v63 = vrot.slane %v3231_v23, %v5358_v29  ;;  %v3198_v48 = vcombine.low %v3190_v14, %v3197_v7 }
 0x4b0   :  { %v3201_v40 = vcombine.low %v3128_v32, %v3129_v21 }
 0x4b3   :  { %v3110_v36 = vpop.permute.xlu0 %3109 }
 0x4b4   :  { %v3115_v43 = vrot.slane %v3110_v36, %v4433_v62  ;;  %v3223_v62 = vrot.slane %v3201_v40, %v5358_v29 }
 0x4b6   :  { %v3131_v16 = vmul.f32 %v3115_v43, %v2939_v42 }
 0x4b8   :  { %v3202_v53 = vcombine.low %v3130_v12, %v3131_v16 }
 0x4ba   :  { %v3230_v58 = vrot.slane %v3202_v53, %v5358_v29 }
 0x4bc   :  { %v3232_v44 = vcombine.low %v3223_v62, %v3230_v58 }
 0x4be   :  { %v3246_v37 = vrot.slane %v3232_v44, %v5358_v29 }
 0x4c0   :  { %v3247_v57 = vcombine.low %v3239_v63, %v3246_v37 }
 0x4c2   :  { %v3251_v55 = vpack.c.bf16 %v3247_v57, %v3198_v48 }
 0x4c4   :  { %3419 = vmatprep.mubr.bf16.mxu0 %v3251_v55 }
 0x4c5   :  { %3420 = vmatmul.mubr.bf16.vlgmr.msra.gmra.mrb[60].mxu0 %v3250_v20 }
 0x4c6   :  { %4134 = shalt.err (!%p4131_p4)
}
 0x4c7   :  { %s4135_s23 = scalar_lea.hbm %s5299_s10, 256 }
 0x4c8   :  { %p4136_p5 = scmp.ne.s32.totalorder %s5299_s10, %s4135_s23  ;;  %p4139_p6 = scmp.lt.u32.totalorder %s4135_s23, %s5299_s10 }
 0x4ca   :  { %p4141_p7 = pnand %p4139_p6, %p4136_p5 }
 0x4cc   :  { %4144 = shalt.err (!%p4141_p7)
}
 0x4cd   :  { %s4153_s28 = smov 128   ;;  %s4154_s1 = smov 8   ;;  %v3538_v25 = vld [vmem:[%s5297_s8] ss:$0 sm:$0xff] }
 0x4ce   :  { %3453 = dma.vmem_to_hbm [thread:$0]  %s3448_s19, 256, %s5299_s10, [#allocation6], %s4153_s28, %s4153_s28, %s4154_s1  }
 0x598   :  { %v3662_v33 = vpop.f32.mrb[60].mxu0 }
 0x599   :  { %v3663_v47 = vpop.f32.mrb[61].mxu0 }
 0x59a   :  { %v3664_v28 = vadd.f32 %v3663_v47, %v3662_v33  ;;  %v3665_v61 = vpop.f32.mrb[62].mxu0 }
 0x59b   :  { %v3666_v50 = vpop.f32.mrb[63].mxu0 }
 0x59c   :  { %v3422_v10 = vadd.f32 %v3664_v28, %v3538_v25  ;;  %v3667_v35 = vadd.f32 %v3666_v50, %v3665_v61 }
 0x59e   :  { %v3425_v3 = vadd.f32 %v3667_v35, %v3538_v25  ;;  %4119 = vtanh.f32 %v3422_v10 }
 0x5a0   :  { %4121 = vtanh.f32 %v3425_v3 }
 0x5a8   :  { %v4120_v22 = vpop.eup %4119 }
 0x5aa   :  { %v4122_v26 = vpop.eup %4121 }
 0x5ab   :  { %v3562_v54 = vpack.c.bf16 %v4122_v26, %v4120_v22 }
 0x5ad   :  { %3563 = vst [vmem:[%s5298_s9] sm:$0xff] %v3562_v54  }
 0x5ae   :  { %4145 = dma.done.wait [#allocation6], 256  }
 0x5af   :  { %4146 = vsyncadd [#allocation6], 4294967040 }
 0x5b0   :  { %3459 = vsyncpa [#allocation6], 1 }

</bundles_post_ra>
